<compile_context>
chip_gen: v6e
topology: v6e:2x2x1
jax: 0.10.0
libtpu: 0.0.40
codegen_flags: <defaults>
</compile_context>

<pallas_src>
import jax
import jax.numpy as jnp
from jax.experimental import pallas as pl
from jax.experimental.pallas import tpu as pltpu


def _round_up(x, m):
    return ((x + m - 1) // m) * m


def _cincual_kernel(
    q_ref,      # (TB, D)        bf16
    opt_ref,    # (TB, 4*D)      bf16  (options flattened along lanes)
    wq_ref,     # (D, H)         bf16
    bq_ref,     # (1, H)         f32
    wopt_ref,   # (4, D, H)      bf16
    bopt_ref,   # (4, 1, H)      f32
    w1_ref,     # (5*H, H)       bf16
    b1_ref,     # (1, H)         f32
    w2_ref,     # (H, Cp)        bf16  (zero-padded classes)
    b2_ref,     # (1, Cp)        f32   (zero-padded classes)
    out_ref,    # (TB, Cp)       bf16
    slab_ref,   # (TB, 5*H)      bf16 VMEM scratch: concat of branch features
):
    D = q_ref.shape[1]
    H = wq_ref.shape[1]

    # q branch: Linear -> ReLU (-> Dropout == identity).  bf16 MXU, f32 acc.
    q_feat = jnp.maximum(
        jnp.dot(q_ref[...], wq_ref[...], preferred_element_type=jnp.float32)
        + bq_ref[...],
        0.0,
    )
    slab_ref[:, 0:H] = q_feat.astype(slab_ref.dtype)

    # 4 option branches.  opt_ref slices are static and lane-aligned (D%128==0).
    # Each feature is written once into its 128-lane-aligned slab slice instead
    # of being kept live for a jnp.concatenate (avoids vreg spills/concat copy).
    for i in range(4):
        f = jnp.maximum(
            jnp.dot(opt_ref[:, i * D:(i + 1) * D], wopt_ref[i],
                    preferred_element_type=jnp.float32)
            + bopt_ref[i],
            0.0,
        )
        slab_ref[:, (i + 1) * H:(i + 2) * H] = f.astype(slab_ref.dtype)

    # One fat K = 5*H MXU pass over the slab (fills the 256-deep MXU on v6e/v7x).
    hidden = jnp.maximum(
        jnp.dot(slab_ref[...], w1_ref[...], preferred_element_type=jnp.float32)
        + b1_ref[...],
        0.0,
    )

    out = (
        jnp.dot(hidden.astype(jnp.bfloat16), w2_ref[...],
                preferred_element_type=jnp.float32)
        + b2_ref[...]
    )
    out_ref[...] = out.astype(out_ref.dtype)


def _choose_batch_tile(B):
    """Minimize batch padding; prefer >=2 grid steps for mid/large B."""
    if B <= 128:
        return _round_up(B, 8)              # single tile, sublane-aligned
    if B <= 512:
        return 128                          # 2..4 steps: megacore split / overlap
    pad128 = _round_up(B, 128) - B
    pad256 = _round_up(B, 256) - B
    return 256 if pad256 <= pad128 else 128


def _const_index_map(rank):
    zeros = (0,) * rank
    return lambda i: zeros


def _forward_impl(q_emb, option_embs, params, *, num_classes,
                  single_buffer_weights):
    B, D = q_emb.shape
    n_opt = option_embs.shape[1]
    assert n_opt == 4, "module has exactly 4 option branches"
    H = params["wq"].shape[1]
    Cp = params["w2"].shape[1]              # already padded to a lane multiple
    C = num_classes
    assert D % 128 == 0, f"input_dim must be a multiple of 128, got {D}"
    assert H % 128 == 0, f"hidden_dim must be a multiple of 128, got {H}"
    assert Cp % 128 == 0

    TB = _choose_batch_tile(B)
    B_pad = _round_up(B, TB)

    # (B, 4, D) -> (B, 4*D): free contiguous reshape.  Cast to bf16 here so the
    # kernel streams half the activation bytes; fused with the batch pad.
    q = q_emb.astype(jnp.bfloat16)
    opt_flat = option_embs.reshape(B, n_opt * D).astype(jnp.bfloat16)
    if B_pad != B:
        q = jnp.pad(q, ((0, B_pad - B), (0, 0)))
        opt_flat = jnp.pad(opt_flat, ((0, B_pad - B), (0, 0)))

    grid = (B_pad // TB,)

    # Weights/biases: constant index_maps keep them VMEM-resident across the
    # batch grid; single-buffer them (nothing to prefetch) when supported.
    def wspec(shape):
        idx = _const_index_map(len(shape))
        if single_buffer_weights:
            return pl.BlockSpec(shape, idx, pipeline_mode=pl.Buffered(1))
        return pl.BlockSpec(shape, idx)

    flops = 2 * B_pad * ((n_opt + 1) * D * H + (n_opt + 1) * H * H + H * Cp)
    bytes_accessed = (
        2 * ((n_opt + 1) * D * H + (n_opt + 1) * H * H + H * Cp)   # bf16 weights
        + 4 * ((n_opt + 2) * H + Cp)                               # f32 biases
        + 2 * B_pad * (n_opt + 1) * D                              # bf16 activations
        + 2 * B_pad * Cp                                           # bf16 output
    )

    weight_bytes = (
        2 * ((n_opt + 1) * D * H + (n_opt + 1) * H * H + H * Cp)
        + 4 * ((n_opt + 2) * H + Cp)
    )
    act_tile_bytes = 2 * TB * (n_opt + 1) * D        # bf16 q + options per buffer
    out_tile_bytes = 2 * TB * Cp
    slab_bytes = 2 * TB * (n_opt + 1) * H
    weight_bufs = 1 if single_buffer_weights else 2
    vmem_needed = (weight_bufs * weight_bytes
                   + 2 * (act_tile_bytes + out_tile_bytes) + slab_bytes)
    vmem_limit = max(32 << 20, min(112 << 20, int(1.4 * vmem_needed)))

    out = pl.pallas_call(
        _cincual_kernel,
        out_shape=jax.ShapeDtypeStruct((B_pad, Cp), jnp.bfloat16),
        grid=grid,
        in_specs=[
            pl.BlockSpec((TB, D), lambda i: (i, 0)),             # q (batch-tiled)
            pl.BlockSpec((TB, n_opt * D), lambda i: (i, 0)),     # options (tiled)
            wspec((D, H)),                                       # wq   (resident)
            wspec((1, H)),                                       # bq
            wspec((n_opt, D, H)),                                # wopt (resident)
            wspec((n_opt, 1, H)),                                # bopt
            wspec(((n_opt + 1) * H, H)),                         # w1   (resident)
            wspec((1, H)),                                       # b1
            wspec((H, Cp)),                                      # w2   (resident)
            wspec((1, Cp)),                                      # b2
        ],
        out_specs=pl.BlockSpec((TB, Cp), lambda i: (i, 0)),
        scratch_shapes=[pltpu.VMEM((TB, (n_opt + 1) * H), jnp.bfloat16)],
        compiler_params=pltpu.CompilerParams(
            dimension_semantics=("parallel",),
            vmem_limit_bytes=vmem_limit),
        cost_estimate=pl.CostEstimate(
            flops=flops, transcendentals=0, bytes_accessed=bytes_accessed),
    )(q, opt_flat,
      params["wq"], params["bq"], params["wopt"], params["bopt"],
      params["w1"], params["b1"], params["w2"], params["b2"])

    return out[:B, :C].astype(jnp.float32)


_forward = jax.jit(
    _forward_impl, static_argnames=("num_classes", "single_buffer_weights"))


def cincual_input_mlp(q_emb, option_embs, params, *, num_classes):
    """CincualInputMLP forward.  `params` must come from prepare_params()."""
    try:
        return _forward(q_emb, option_embs, params,
                        num_classes=num_classes, single_buffer_weights=True)
    except Exception:
        # Fallback for JAX builds without BlockSpec.pipeline_mode support:
        # identical semantics, default double-buffered weights.
        return _forward(q_emb, option_embs, params,
                        num_classes=num_classes, single_buffer_weights=False)


def prepare_params(params, lane=128):
    """One-time conversion of f32 params: weights -> bf16, final projection
    zero-padded to a lane-dense width.  Call OUTSIDE the jitted forward so the
    weights are not re-cast through HBM on every invocation."""
    C = params["w2"].shape[1]
    Cp = _round_up(C, lane)
    return {
        "wq": params["wq"].astype(jnp.bfloat16),
        "bq": params["bq"].astype(jnp.float32),
        "wopt": params["wopt"].astype(jnp.bfloat16),
        "bopt": params["bopt"].astype(jnp.float32),
        "w1": params["w1"].astype(jnp.bfloat16),
        "b1": params["b1"].astype(jnp.float32),
        "w2": jnp.pad(params["w2"], ((0, 0), (0, Cp - C))).astype(jnp.bfloat16),
        "b2": jnp.pad(params["b2"], ((0, 0), (0, Cp - C))).astype(jnp.float32),
    }


def init_params(key, input_dim, hidden_dim, num_classes):
    ks = jax.random.split(key, 8)
    s_in = 1.0 / jnp.sqrt(input_dim)
    s_h5 = 1.0 / jnp.sqrt(5 * hidden_dim)
    s_h = 1.0 / jnp.sqrt(hidden_dim)
    return {
        # q branch
        "wq": jax.random.uniform(ks[0], (input_dim, hidden_dim), jnp.float32, -s_in, s_in),
        "bq": jax.random.uniform(ks[1], (1, hidden_dim), jnp.float32, -s_in, s_in),
        # 4 option branches
        "wopt": jax.random.uniform(ks[2], (4, input_dim, hidden_dim), jnp.float32, -s_in, s_in),
        "bopt": jax.random.uniform(ks[3], (4, 1, hidden_dim), jnp.float32, -s_in, s_in),
        # combined head
        "w1": jax.random.uniform(ks[4], (5 * hidden_dim, hidden_dim), jnp.float32, -s_h5, s_h5),
        "b1": jax.random.uniform(ks[5], (1, hidden_dim), jnp.float32, -s_h5, s_h5),
        "w2": jax.random.uniform(ks[6], (hidden_dim, num_classes), jnp.float32, -s_h, s_h),
        "b2": jax.random.uniform(ks[7], (1, num_classes), jnp.float32, -s_h, s_h),
    }


def reference_forward(q_emb, option_embs, params):
    """Pure-JAX f32 reference (eval-mode dropout == identity)."""
    q_feat = jax.nn.relu(q_emb @ params["wq"] + params["bq"])
    feats = [q_feat]
    for i in range(4):
        feats.append(
            jax.nn.relu(option_embs[:, i] @ params["wopt"][i] + params["bopt"][i])
        )
    combined = jnp.concatenate(feats, axis=1)
    hidden = jax.nn.relu(combined @ params["w1"] + params["b1"])
    return hidden @ params["w2"] + params["b2"]


if __name__ == "__main__":
    # Small shapes consistent with the module's forward contract
    # (lane-aligned D and H; num_classes=4 as in the PyTorch default).
    batch = 8
    input_dim = 256
    hidden_dim = 128
    num_classes = 4

    key = jax.random.PRNGKey(0)
    k_params, k_q, k_opt = jax.random.split(key, 3)

    params_f32 = init_params(k_params, input_dim, hidden_dim, num_classes)
    params = prepare_params(params_f32)        # one-time bf16 conversion

    q_emb = jax.random.normal(k_q, (batch, input_dim), jnp.float32)
    option_embs = jax.random.normal(k_opt, (batch, 4, input_dim), jnp.float32)

    out = cincual_input_mlp(q_emb, option_embs, params, num_classes=num_classes)
    out = jax.block_until_ready(out)

    ref = reference_forward(q_emb, option_embs, params_f32)
    assert out.shape == (batch, num_classes)
    # bf16 weights/activations/output with f32 MXU accumulation -> looser
    # tolerance than the pure-f32 reference path.
    assert jnp.allclose(out, ref, atol=5e-2, rtol=5e-2), "mismatch vs reference"

    print("KERNEL_OK")
</pallas_src>

<mosaic_0001>
module attributes {stable_mosaic.version = 11 : i64} {
  func.func @_cincual_kernel(%arg0: i32, %arg1: memref<8x256xbf16, #tpu.memory_space<vmem>>, %arg2: memref<8x1024xbf16, #tpu.memory_space<vmem>>, %arg3: memref<256x128xbf16, #tpu.memory_space<vmem>>, %arg4: memref<1x128xf32, #tpu.memory_space<vmem>>, %arg5: memref<4x256x128xbf16, #tpu.memory_space<vmem>>, %arg6: memref<4x1x128xf32, #tpu.memory_space<vmem>>, %arg7: memref<640x128xbf16, #tpu.memory_space<vmem>>, %arg8: memref<1x128xf32, #tpu.memory_space<vmem>>, %arg9: memref<128x128xbf16, #tpu.memory_space<vmem>>, %arg10: memref<1x128xf32, #tpu.memory_space<vmem>>, %arg11: memref<8x128xbf16, #tpu.memory_space<vmem>>, %arg12: memref<8x640xbf16, #tpu.memory_space<vmem>>) attributes {dimension_semantics = [#tpu.dimension_semantics<parallel>], iteration_bounds = array<i64: 1>, scalar_prefetch = 0 : i64, scratch_operands = 1 : i64, tpu.core_type = #tpu.core_type<tc>, window_params = [{transform_indices = @transform_0, window_bounds = array<i64: 8, 256>}, {transform_indices = @transform_1, window_bounds = array<i64: 8, 1024>}, {pipeline_mode = #tpu.pipeline_mode<synchronous>, transform_indices = @transform_2, window_bounds = array<i64: 256, 128>}, {pipeline_mode = #tpu.pipeline_mode<synchronous>, transform_indices = @transform_3, window_bounds = array<i64: 1, 128>}, {pipeline_mode = #tpu.pipeline_mode<synchronous>, transform_indices = @transform_4, window_bounds = array<i64: 4, 256, 128>}, {pipeline_mode = #tpu.pipeline_mode<synchronous>, transform_indices = @transform_5, window_bounds = array<i64: 4, 1, 128>}, {pipeline_mode = #tpu.pipeline_mode<synchronous>, transform_indices = @transform_6, window_bounds = array<i64: 640, 128>}, {pipeline_mode = #tpu.pipeline_mode<synchronous>, transform_indices = @transform_7, window_bounds = array<i64: 1, 128>}, {pipeline_mode = #tpu.pipeline_mode<synchronous>, transform_indices = @transform_8, window_bounds = array<i64: 128, 128>}, {pipeline_mode = #tpu.pipeline_mode<synchronous>, transform_indices = @transform_9, window_bounds = array<i64: 1, 128>}, {transform_indices = @transform_10, window_bounds = array<i64: 8, 128>}]} {
    %c0 = arith.constant 0 : index
    %c0_0 = arith.constant 0 : index
    %0 = vector.load %arg1[%c0, %c0_0] : memref<8x256xbf16, #tpu.memory_space<vmem>>, vector<8x256xbf16>
    %c0_1 = arith.constant 0 : index
    %c0_2 = arith.constant 0 : index
    %1 = vector.load %arg3[%c0_1, %c0_2] : memref<256x128xbf16, #tpu.memory_space<vmem>>, vector<256x128xbf16>
    %cst = arith.constant dense<0.000000e+00> : vector<8x128xf32>
    %2 = tpu.matmul %0, %1, %cst {dimension_numbers = #tpu.dot_dimension_numbers<[1], [0], [0], [1], [0, 0, 1, 1], [], []>} : vector<8x256xbf16>, vector<256x128xbf16>, vector<8x128xf32> -> vector<8x128xf32>
    %c0_3 = arith.constant 0 : index
    %c0_4 = arith.constant 0 : index
    %3 = vector.load %arg4[%c0_3, %c0_4] : memref<1x128xf32, #tpu.memory_space<vmem>>, vector<1x128xf32>
    %4 = vector.broadcast %3 : vector<1x128xf32> to vector<8x128xf32>
    %5 = arith.addf %2, %4 : vector<8x128xf32>
    %cst_5 = arith.constant 0.000000e+00 : f32
    %6 = vector.broadcast %cst_5 : f32 to vector<8x128xf32>
    %7 = arith.maximumf %5, %6 : vector<8x128xf32>
    %8 = arith.truncf %7 : vector<8x128xf32> to vector<8x128xbf16>
    %c0_6 = arith.constant 0 : index
    %c0_7 = arith.constant 0 : index
    %9 = vector.load %arg12[%c0_6, %c0_7] : memref<8x640xbf16, #tpu.memory_space<vmem>>, vector<8x128xbf16>
    tpu.vector_store %arg12[%c0_6, %c0_7], %8 {strides = array<i32>} : memref<8x640xbf16, #tpu.memory_space<vmem>>, vector<8x128xbf16>,
    %c0_8 = arith.constant 0 : index
    %c0_9 = arith.constant 0 : index
    %10 = vector.load %arg2[%c0_8, %c0_9] : memref<8x1024xbf16, #tpu.memory_space<vmem>>, vector<8x256xbf16>
    %c0_10 = arith.constant 0 : index
    %c0_11 = arith.constant 0 : index
    %c0_12 = arith.constant 0 : index
    %11 = vector.load %arg5[%c0_10, %c0_11, %c0_12] : memref<4x256x128xbf16, #tpu.memory_space<vmem>>, vector<1x256x128xbf16>
    %12 = vector.shape_cast %11 : vector<1x256x128xbf16> to vector<256x128xbf16>
    %cst_13 = arith.constant dense<0.000000e+00> : vector<8x128xf32>
    %13 = tpu.matmul %10, %12, %cst_13 {dimension_numbers = #tpu.dot_dimension_numbers<[1], [0], [0], [1], [0, 0, 1, 1], [], []>} : vector<8x256xbf16>, vector<256x128xbf16>, vector<8x128xf32> -> vector<8x128xf32>
    %c0_14 = arith.constant 0 : index
    %c0_15 = arith.constant 0 : index
    %c0_16 = arith.constant 0 : index
    %14 = vector.load %arg6[%c0_14, %c0_15, %c0_16] : memref<4x1x128xf32, #tpu.memory_space<vmem>>, vector<1x1x128xf32>
    %15 = vector.shape_cast %14 : vector<1x1x128xf32> to vector<1x128xf32>
    %16 = vector.broadcast %15 : vector<1x128xf32> to vector<8x128xf32>
    %17 = arith.addf %13, %16 : vector<8x128xf32>
    %cst_17 = arith.constant 0.000000e+00 : f32
    %18 = vector.broadcast %cst_17 : f32 to vector<8x128xf32>
    %19 = arith.maximumf %17, %18 : vector<8x128xf32>
    %20 = arith.truncf %19 : vector<8x128xf32> to vector<8x128xbf16>
    %c0_18 = arith.constant 0 : index
    %c128 = arith.constant 128 : index
    %21 = vector.load %arg12[%c0_18, %c128] : memref<8x640xbf16, #tpu.memory_space<vmem>>, vector<8x128xbf16>
    tpu.vector_store %arg12[%c0_18, %c128], %20 {strides = array<i32>} : memref<8x640xbf16, #tpu.memory_space<vmem>>, vector<8x128xbf16>,
    %c0_19 = arith.constant 0 : index
    %c256 = arith.constant 256 : index
    %22 = vector.load %arg2[%c0_19, %c256] : memref<8x1024xbf16, #tpu.memory_space<vmem>>, vector<8x256xbf16>
    %c1 = arith.constant 1 : index
    %c0_20 = arith.constant 0 : index
    %c0_21 = arith.constant 0 : index
    %23 = vector.load %arg5[%c1, %c0_20, %c0_21] : memref<4x256x128xbf16, #tpu.memory_space<vmem>>, vector<1x256x128xbf16>
    %24 = vector.shape_cast %23 : vector<1x256x128xbf16> to vector<256x128xbf16>
    %cst_22 = arith.constant dense<0.000000e+00> : vector<8x128xf32>
    %25 = tpu.matmul %22, %24, %cst_22 {dimension_numbers = #tpu.dot_dimension_numbers<[1], [0], [0], [1], [0, 0, 1, 1], [], []>} : vector<8x256xbf16>, vector<256x128xbf16>, vector<8x128xf32> -> vector<8x128xf32>
    %c1_23 = arith.constant 1 : index
    %c0_24 = arith.constant 0 : index
    %c0_25 = arith.constant 0 : index
    %26 = vector.load %arg6[%c1_23, %c0_24, %c0_25] : memref<4x1x128xf32, #tpu.memory_space<vmem>>, vector<1x1x128xf32>
    %27 = vector.shape_cast %26 : vector<1x1x128xf32> to vector<1x128xf32>
    %28 = vector.broadcast %27 : vector<1x128xf32> to vector<8x128xf32>
    %29 = arith.addf %25, %28 : vector<8x128xf32>
    %cst_26 = arith.constant 0.000000e+00 : f32
    %30 = vector.broadcast %cst_26 : f32 to vector<8x128xf32>
    %31 = arith.maximumf %29, %30 : vector<8x128xf32>
    %32 = arith.truncf %31 : vector<8x128xf32> to vector<8x128xbf16>
    %c0_27 = arith.constant 0 : index
    %c256_28 = arith.constant 256 : index
    %33 = vector.load %arg12[%c0_27, %c256_28] : memref<8x640xbf16, #tpu.memory_space<vmem>>, vector<8x128xbf16>
    tpu.vector_store %arg12[%c0_27, %c256_28], %32 {strides = array<i32>} : memref<8x640xbf16, #tpu.memory_space<vmem>>, vector<8x128xbf16>,
    %c0_29 = arith.constant 0 : index
    %c512 = arith.constant 512 : index
    %34 = vector.load %arg2[%c0_29, %c512] : memref<8x1024xbf16, #tpu.memory_space<vmem>>, vector<8x256xbf16>
    %c2 = arith.constant 2 : index
    %c0_30 = arith.constant 0 : index
    %c0_31 = arith.constant 0 : index
    %35 = vector.load %arg5[%c2, %c0_30, %c0_31] : memref<4x256x128xbf16, #tpu.memory_space<vmem>>, vector<1x256x128xbf16>
    %36 = vector.shape_cast %35 : vector<1x256x128xbf16> to vector<256x128xbf16>
    %cst_32 = arith.constant dense<0.000000e+00> : vector<8x128xf32>
    %37 = tpu.matmul %34, %36, %cst_32 {dimension_numbers = #tpu.dot_dimension_numbers<[1], [0], [0], [1], [0, 0, 1, 1], [], []>} : vector<8x256xbf16>, vector<256x128xbf16>, vector<8x128xf32> -> vector<8x128xf32>
    %c2_33 = arith.constant 2 : index
    %c0_34 = arith.constant 0 : index
    %c0_35 = arith.constant 0 : index
    %38 = vector.load %arg6[%c2_33, %c0_34, %c0_35] : memref<4x1x128xf32, #tpu.memory_space<vmem>>, vector<1x1x128xf32>
    %39 = vector.shape_cast %38 : vector<1x1x128xf32> to vector<1x128xf32>
    %40 = vector.broadcast %39 : vector<1x128xf32> to vector<8x128xf32>
    %41 = arith.addf %37, %40 : vector<8x128xf32>
    %cst_36 = arith.constant 0.000000e+00 : f32
    %42 = vector.broadcast %cst_36 : f32 to vector<8x128xf32>
    %43 = arith.maximumf %41, %42 : vector<8x128xf32>
    %44 = arith.truncf %43 : vector<8x128xf32> to vector<8x128xbf16>
    %c0_37 = arith.constant 0 : index
    %c384 = arith.constant 384 : index
    %45 = vector.load %arg12[%c0_37, %c384] : memref<8x640xbf16, #tpu.memory_space<vmem>>, vector<8x128xbf16>
    tpu.vector_store %arg12[%c0_37, %c384], %44 {strides = array<i32>} : memref<8x640xbf16, #tpu.memory_space<vmem>>, vector<8x128xbf16>,
    %c0_38 = arith.constant 0 : index
    %c768 = arith.constant 768 : index
    %46 = vector.load %arg2[%c0_38, %c768] : memref<8x1024xbf16, #tpu.memory_space<vmem>>, vector<8x256xbf16>
    %c3 = arith.constant 3 : index
    %c0_39 = arith.constant 0 : index
    %c0_40 = arith.constant 0 : index
    %47 = vector.load %arg5[%c3, %c0_39, %c0_40] : memref<4x256x128xbf16, #tpu.memory_space<vmem>>, vector<1x256x128xbf16>
    %48 = vector.shape_cast %47 : vector<1x256x128xbf16> to vector<256x128xbf16>
    %cst_41 = arith.constant dense<0.000000e+00> : vector<8x128xf32>
    %49 = tpu.matmul %46, %48, %cst_41 {dimension_numbers = #tpu.dot_dimension_numbers<[1], [0], [0], [1], [0, 0, 1, 1], [], []>} : vector<8x256xbf16>, vector<256x128xbf16>, vector<8x128xf32> -> vector<8x128xf32>
    %c3_42 = arith.constant 3 : index
    %c0_43 = arith.constant 0 : index
    %c0_44 = arith.constant 0 : index
    %50 = vector.load %arg6[%c3_42, %c0_43, %c0_44] : memref<4x1x128xf32, #tpu.memory_space<vmem>>, vector<1x1x128xf32>
    %51 = vector.shape_cast %50 : vector<1x1x128xf32> to vector<1x128xf32>
    %52 = vector.broadcast %51 : vector<1x128xf32> to vector<8x128xf32>
    %53 = arith.addf %49, %52 : vector<8x128xf32>
    %cst_45 = arith.constant 0.000000e+00 : f32
    %54 = vector.broadcast %cst_45 : f32 to vector<8x128xf32>
    %55 = arith.maximumf %53, %54 : vector<8x128xf32>
    %56 = arith.truncf %55 : vector<8x128xf32> to vector<8x128xbf16>
    %c0_46 = arith.constant 0 : index
    %c512_47 = arith.constant 512 : index
    %57 = vector.load %arg12[%c0_46, %c512_47] : memref<8x640xbf16, #tpu.memory_space<vmem>>, vector<8x128xbf16>
    tpu.vector_store %arg12[%c0_46, %c512_47], %56 {strides = array<i32>} : memref<8x640xbf16, #tpu.memory_space<vmem>>, vector<8x128xbf16>,
    %c0_48 = arith.constant 0 : index
    %c0_49 = arith.constant 0 : index
    %58 = vector.load %arg12[%c0_48, %c0_49] : memref<8x640xbf16, #tpu.memory_space<vmem>>, vector<8x640xbf16>
    %c0_50 = arith.constant 0 : index
    %c0_51 = arith.constant 0 : index
    %59 = vector.load %arg7[%c0_50, %c0_51] : memref<640x128xbf16, #tpu.memory_space<vmem>>, vector<640x128xbf16>
    %cst_52 = arith.constant dense<0.000000e+00> : vector<8x128xf32>
    %60 = tpu.matmul %58, %59, %cst_52 {dimension_numbers = #tpu.dot_dimension_numbers<[1], [0], [0], [1], [0, 0, 1, 1], [], []>} : vector<8x640xbf16>, vector<640x128xbf16>, vector<8x128xf32> -> vector<8x128xf32>
    %c0_53 = arith.constant 0 : index
    %c0_54 = arith.constant 0 : index
    %61 = vector.load %arg8[%c0_53, %c0_54] : memref<1x128xf32, #tpu.memory_space<vmem>>, vector<1x128xf32>
    %62 = vector.broadcast %61 : vector<1x128xf32> to vector<8x128xf32>
    %63 = arith.addf %60, %62 : vector<8x128xf32>
    %cst_55 = arith.constant 0.000000e+00 : f32
    %64 = vector.broadcast %cst_55 : f32 to vector<8x128xf32>
    %65 = arith.maximumf %63, %64 : vector<8x128xf32>
    %66 = arith.truncf %65 : vector<8x128xf32> to vector<8x128xbf16>
    %c0_56 = arith.constant 0 : index
    %c0_57 = arith.constant 0 : index
    %67 = vector.load %arg9[%c0_56, %c0_57] : memref<128x128xbf16, #tpu.memory_space<vmem>>, vector<128x128xbf16>
    %cst_58 = arith.constant dense<0.000000e+00> : vector<8x128xf32>
    %68 = tpu.matmul %66, %67, %cst_58 {dimension_numbers = #tpu.dot_dimension_numbers<[1], [0], [0], [1], [0, 0, 1, 1], [], []>} : vector<8x128xbf16>, vector<128x128xbf16>, vector<8x128xf32> -> vector<8x128xf32>
    %c0_59 = arith.constant 0 : index
    %c0_60 = arith.constant 0 : index
    %69 = vector.load %arg10[%c0_59, %c0_60] : memref<1x128xf32, #tpu.memory_space<vmem>>, vector<1x128xf32>
    %70 = vector.broadcast %69 : vector<1x128xf32> to vector<8x128xf32>
    %71 = arith.addf %68, %70 : vector<8x128xf32>
    %72 = arith.truncf %71 : vector<8x128xf32> to vector<8x128xbf16>
    %c0_61 = arith.constant 0 : index
    %c0_62 = arith.constant 0 : index
    %73 = vector.load %arg11[%c0_61, %c0_62] : memref<8x128xbf16, #tpu.memory_space<vmem>>, vector<8x128xbf16>
    tpu.vector_store %arg11[%c0_61, %c0_62], %72 {strides = array<i32>} : memref<8x128xbf16, #tpu.memory_space<vmem>>, vector<8x128xbf16>,
    return
  }
  func.func @transform_0(%arg0: i32) -> (i32, i32) {
    %c0_i32 = arith.constant 0 : i32
    %c0_i32_0 = arith.constant 0 : i32
    return %arg0, %c0_i32 : i32, i32
  }
  func.func @transform_1(%arg0: i32) -> (i32, i32) {
    %c0_i32 = arith.constant 0 : i32
    %c0_i32_0 = arith.constant 0 : i32
    return %arg0, %c0_i32 : i32, i32
  }
  func.func @transform_2(%arg0: i32) -> (i32, i32) {
    %c0_i32 = arith.constant 0 : i32
    %c0_i32_0 = arith.constant 0 : i32
    %c0_i32_1 = arith.constant 0 : i32
    return %c0_i32, %c0_i32_0 : i32, i32
  }
  func.func @transform_3(%arg0: i32) -> (i32, i32) {
    %c0_i32 = arith.constant 0 : i32
    %c0_i32_0 = arith.constant 0 : i32
    %c0_i32_1 = arith.constant 0 : i32
    return %c0_i32, %c0_i32_0 : i32, i32
  }
  func.func @transform_4(%arg0: i32) -> (i32, i32, i32) {
    %c0_i32 = arith.constant 0 : i32
    %c0_i32_0 = arith.constant 0 : i32
    %c0_i32_1 = arith.constant 0 : i32
    %c0_i32_2 = arith.constant 0 : i32
    return %c0_i32, %c0_i32_0, %c0_i32_1 : i32, i32, i32
  }
  func.func @transform_5(%arg0: i32) -> (i32, i32, i32) {
    %c0_i32 = arith.constant 0 : i32
    %c0_i32_0 = arith.constant 0 : i32
    %c0_i32_1 = arith.constant 0 : i32
    %c0_i32_2 = arith.constant 0 : i32
    return %c0_i32, %c0_i32_0, %c0_i32_1 : i32, i32, i32
  }
  func.func @transform_6(%arg0: i32) -> (i32, i32) {
    %c0_i32 = arith.constant 0 : i32
    %c0_i32_0 = arith.constant 0 : i32
    %c0_i32_1 = arith.constant 0 : i32
    return %c0_i32, %c0_i32_0 : i32, i32
  }
  func.func @transform_7(%arg0: i32) -> (i32, i32) {
    %c0_i32 = arith.constant 0 : i32
    %c0_i32_0 = arith.constant 0 : i32
    %c0_i32_1 = arith.constant 0 : i32
    return %c0_i32, %c0_i32_0 : i32, i32
  }
  func.func @transform_8(%arg0: i32) -> (i32, i32) {
    %c0_i32 = arith.constant 0 : i32
    %c0_i32_0 = arith.constant 0 : i32
    %c0_i32_1 = arith.constant 0 : i32
    return %c0_i32, %c0_i32_0 : i32, i32
  }
  func.func @transform_9(%arg0: i32) -> (i32, i32) {
    %c0_i32 = arith.constant 0 : i32
    %c0_i32_0 = arith.constant 0 : i32
    %c0_i32_1 = arith.constant 0 : i32
    return %c0_i32, %c0_i32_0 : i32, i32
  }
  func.func @transform_10(%arg0: i32) -> (i32, i32) {
    %c0_i32 = arith.constant 0 : i32
    %c0_i32_0 = arith.constant 0 : i32
    return %arg0, %c0_i32 : i32, i32
  }
}

module attributes {stable_mosaic.version = 11 : i64} {
  func.func @_cincual_kernel(%arg0: i32, %arg1: memref<8x256xbf16, #tpu.memory_space<vmem>>, %arg2: memref<8x1024xbf16, #tpu.memory_space<vmem>>, %arg3: memref<256x128xbf16, #tpu.memory_space<vmem>>, %arg4: memref<1x128xf32, #tpu.memory_space<vmem>>, %arg5: memref<4x256x128xbf16, #tpu.memory_space<vmem>>, %arg6: memref<4x1x128xf32, #tpu.memory_space<vmem>>, %arg7: memref<640x128xbf16, #tpu.memory_space<vmem>>, %arg8: memref<1x128xf32, #tpu.memory_space<vmem>>, %arg9: memref<128x128xbf16, #tpu.memory_space<vmem>>, %arg10: memref<1x128xf32, #tpu.memory_space<vmem>>, %arg11: memref<8x128xbf16, #tpu.memory_space<vmem>>, %arg12: memref<8x640xbf16, #tpu.memory_space<vmem>>) attributes {dimension_semantics = [#tpu.dimension_semantics<parallel>], iteration_bounds = array<i64: 1>, scalar_prefetch = 0 : i64, scratch_operands = 1 : i64, tpu.core_type = #tpu.core_type<tc>, window_params = [{transform_indices = @transform_0, window_bounds = array<i64: 8, 256>}, {transform_indices = @transform_1, window_bounds = array<i64: 8, 1024>}, {pipeline_mode = #tpu.pipeline_mode<synchronous>, transform_indices = @transform_2, window_bounds = array<i64: 256, 128>}, {pipeline_mode = #tpu.pipeline_mode<synchronous>, transform_indices = @transform_3, window_bounds = array<i64: 1, 128>}, {pipeline_mode = #tpu.pipeline_mode<synchronous>, transform_indices = @transform_4, window_bounds = array<i64: 4, 256, 128>}, {pipeline_mode = #tpu.pipeline_mode<synchronous>, transform_indices = @transform_5, window_bounds = array<i64: 4, 1, 128>}, {pipeline_mode = #tpu.pipeline_mode<synchronous>, transform_indices = @transform_6, window_bounds = array<i64: 640, 128>}, {pipeline_mode = #tpu.pipeline_mode<synchronous>, transform_indices = @transform_7, window_bounds = array<i64: 1, 128>}, {pipeline_mode = #tpu.pipeline_mode<synchronous>, transform_indices = @transform_8, window_bounds = array<i64: 128, 128>}, {pipeline_mode = #tpu.pipeline_mode<synchronous>, transform_indices = @transform_9, window_bounds = array<i64: 1, 128>}, {transform_indices = @transform_10, window_bounds = array<i64: 8, 128>}]} {
    %c0 = arith.constant 0 : index
    %c0_0 = arith.constant 0 : index
    %0 = vector.load %arg1[%c0, %c0_0] : memref<8x256xbf16, #tpu.memory_space<vmem>>, vector<8x256xbf16>
    %c0_1 = arith.constant 0 : index
    %c0_2 = arith.constant 0 : index
    %1 = vector.load %arg3[%c0_1, %c0_2] : memref<256x128xbf16, #tpu.memory_space<vmem>>, vector<256x128xbf16>
    %cst = arith.constant dense<0.000000e+00> : vector<8x128xf32>
    %2 = tpu.matmul %0, %1, %cst {dimension_numbers = #tpu.dot_dimension_numbers<[1], [0], [0], [1], [0, 0, 1, 1], [], []>} : vector<8x256xbf16>, vector<256x128xbf16>, vector<8x128xf32> -> vector<8x128xf32>
    %c0_3 = arith.constant 0 : index
    %c0_4 = arith.constant 0 : index
    %3 = vector.load %arg4[%c0_3, %c0_4] : memref<1x128xf32, #tpu.memory_space<vmem>>, vector<1x128xf32>
    %4 = vector.broadcast %3 : vector<1x128xf32> to vector<8x128xf32>
    %5 = arith.addf %2, %4 : vector<8x128xf32>
    %cst_5 = arith.constant 0.000000e+00 : f32
    %6 = vector.broadcast %cst_5 : f32 to vector<8x128xf32>
    %7 = arith.maximumf %5, %6 : vector<8x128xf32>
    %8 = arith.truncf %7 : vector<8x128xf32> to vector<8x128xbf16>
    %c0_6 = arith.constant 0 : index
    %c0_7 = arith.constant 0 : index
    %9 = vector.load %arg12[%c0_6, %c0_7] : memref<8x640xbf16, #tpu.memory_space<vmem>>, vector<8x128xbf16>
    tpu.vector_store %arg12[%c0_6, %c0_7], %8 {strides = array<i32>} : memref<8x640xbf16, #tpu.memory_space<vmem>>, vector<8x128xbf16>,
    %c0_8 = arith.constant 0 : index
    %c0_9 = arith.constant 0 : index
    %10 = vector.load %arg2[%c0_8, %c0_9] : memref<8x1024xbf16, #tpu.memory_space<vmem>>, vector<8x256xbf16>
    %c0_10 = arith.constant 0 : index
    %c0_11 = arith.constant 0 : index
    %c0_12 = arith.constant 0 : index
    %11 = vector.load %arg5[%c0_10, %c0_11, %c0_12] : memref<4x256x128xbf16, #tpu.memory_space<vmem>>, vector<1x256x128xbf16>
    %12 = vector.shape_cast %11 : vector<1x256x128xbf16> to vector<256x128xbf16>
    %cst_13 = arith.constant dense<0.000000e+00> : vector<8x128xf32>
    %13 = tpu.matmul %10, %12, %cst_13 {dimension_numbers = #tpu.dot_dimension_numbers<[1], [0], [0], [1], [0, 0, 1, 1], [], []>} : vector<8x256xbf16>, vector<256x128xbf16>, vector<8x128xf32> -> vector<8x128xf32>
    %c0_14 = arith.constant 0 : index
    %c0_15 = arith.constant 0 : index
    %c0_16 = arith.constant 0 : index
    %14 = vector.load %arg6[%c0_14, %c0_15, %c0_16] : memref<4x1x128xf32, #tpu.memory_space<vmem>>, vector<1x1x128xf32>
    %15 = vector.shape_cast %14 : vector<1x1x128xf32> to vector<1x128xf32>
    %16 = vector.broadcast %15 : vector<1x128xf32> to vector<8x128xf32>
    %17 = arith.addf %13, %16 : vector<8x128xf32>
    %cst_17 = arith.constant 0.000000e+00 : f32
    %18 = vector.broadcast %cst_17 : f32 to vector<8x128xf32>
    %19 = arith.maximumf %17, %18 : vector<8x128xf32>
    %20 = arith.truncf %19 : vector<8x128xf32> to vector<8x128xbf16>
    %c0_18 = arith.constant 0 : index
    %c128 = arith.constant 128 : index
    %21 = vector.load %arg12[%c0_18, %c128] : memref<8x640xbf16, #tpu.memory_space<vmem>>, vector<8x128xbf16>
    tpu.vector_store %arg12[%c0_18, %c128], %20 {strides = array<i32>} : memref<8x640xbf16, #tpu.memory_space<vmem>>, vector<8x128xbf16>,
    %c0_19 = arith.constant 0 : index
    %c256 = arith.constant 256 : index
    %22 = vector.load %arg2[%c0_19, %c256] : memref<8x1024xbf16, #tpu.memory_space<vmem>>, vector<8x256xbf16>
    %c1 = arith.constant 1 : index
    %c0_20 = arith.constant 0 : index
    %c0_21 = arith.constant 0 : index
    %23 = vector.load %arg5[%c1, %c0_20, %c0_21] : memref<4x256x128xbf16, #tpu.memory_space<vmem>>, vector<1x256x128xbf16>
    %24 = vector.shape_cast %23 : vector<1x256x128xbf16> to vector<256x128xbf16>
    %cst_22 = arith.constant dense<0.000000e+00> : vector<8x128xf32>
    %25 = tpu.matmul %22, %24, %cst_22 {dimension_numbers = #tpu.dot_dimension_numbers<[1], [0], [0], [1], [0, 0, 1, 1], [], []>} : vector<8x256xbf16>, vector<256x128xbf16>, vector<8x128xf32> -> vector<8x128xf32>
    %c1_23 = arith.constant 1 : index
    %c0_24 = arith.constant 0 : index
    %c0_25 = arith.constant 0 : index
    %26 = vector.load %arg6[%c1_23, %c0_24, %c0_25] : memref<4x1x128xf32, #tpu.memory_space<vmem>>, vector<1x1x128xf32>
    %27 = vector.shape_cast %26 : vector<1x1x128xf32> to vector<1x128xf32>
    %28 = vector.broadcast %27 : vector<1x128xf32> to vector<8x128xf32>
    %29 = arith.addf %25, %28 : vector<8x128xf32>
    %cst_26 = arith.constant 0.000000e+00 : f32
    %30 = vector.broadcast %cst_26 : f32 to vector<8x128xf32>
    %31 = arith.maximumf %29, %30 : vector<8x128xf32>
    %32 = arith.truncf %31 : vector<8x128xf32> to vector<8x128xbf16>
    %c0_27 = arith.constant 0 : index
    %c256_28 = arith.constant 256 : index
    %33 = vector.load %arg12[%c0_27, %c256_28] : memref<8x640xbf16, #tpu.memory_space<vmem>>, vector<8x128xbf16>
    tpu.vector_store %arg12[%c0_27, %c256_28], %32 {strides = array<i32>} : memref<8x640xbf16, #tpu.memory_space<vmem>>, vector<8x128xbf16>,
    %c0_29 = arith.constant 0 : index
    %c512 = arith.constant 512 : index
    %34 = vector.load %arg2[%c0_29, %c512] : memref<8x1024xbf16, #tpu.memory_space<vmem>>, vector<8x256xbf16>
    %c2 = arith.constant 2 : index
    %c0_30 = arith.constant 0 : index
    %c0_31 = arith.constant 0 : index
    %35 = vector.load %arg5[%c2, %c0_30, %c0_31] : memref<4x256x128xbf16, #tpu.memory_space<vmem>>, vector<1x256x128xbf16>
    %36 = vector.shape_cast %35 : vector<1x256x128xbf16> to vector<256x128xbf16>
    %cst_32 = arith.constant dense<0.000000e+00> : vector<8x128xf32>
    %37 = tpu.matmul %34, %36, %cst_32 {dimension_numbers = #tpu.dot_dimension_numbers<[1], [0], [0], [1], [0, 0, 1, 1], [], []>} : vector<8x256xbf16>, vector<256x128xbf16>, vector<8x128xf32> -> vector<8x128xf32>
    %c2_33 = arith.constant 2 : index
    %c0_34 = arith.constant 0 : index
    %c0_35 = arith.constant 0 : index
    %38 = vector.load %arg6[%c2_33, %c0_34, %c0_35] : memref<4x1x128xf32, #tpu.memory_space<vmem>>, vector<1x1x128xf32>
    %39 = vector.shape_cast %38 : vector<1x1x128xf32> to vector<1x128xf32>
    %40 = vector.broadcast %39 : vector<1x128xf32> to vector<8x128xf32>
    %41 = arith.addf %37, %40 : vector<8x128xf32>
    %cst_36 = arith.constant 0.000000e+00 : f32
    %42 = vector.broadcast %cst_36 : f32 to vector<8x128xf32>
    %43 = arith.maximumf %41, %42 : vector<8x128xf32>
    %44 = arith.truncf %43 : vector<8x128xf32> to vector<8x128xbf16>
    %c0_37 = arith.constant 0 : index
    %c384 = arith.constant 384 : index
    %45 = vector.load %arg12[%c0_37, %c384] : memref<8x640xbf16, #tpu.memory_space<vmem>>, vector<8x128xbf16>
    tpu.vector_store %arg12[%c0_37, %c384], %44 {strides = array<i32>} : memref<8x640xbf16, #tpu.memory_space<vmem>>, vector<8x128xbf16>,
    %c0_38 = arith.constant 0 : index
    %c768 = arith.constant 768 : index
    %46 = vector.load %arg2[%c0_38, %c768] : memref<8x1024xbf16, #tpu.memory_space<vmem>>, vector<8x256xbf16>
    %c3 = arith.constant 3 : index
    %c0_39 = arith.constant 0 : index
    %c0_40 = arith.constant 0 : index
    %47 = vector.load %arg5[%c3, %c0_39, %c0_40] : memref<4x256x128xbf16, #tpu.memory_space<vmem>>, vector<1x256x128xbf16>
    %48 = vector.shape_cast %47 : vector<1x256x128xbf16> to vector<256x128xbf16>
    %cst_41 = arith.constant dense<0.000000e+00> : vector<8x128xf32>
    %49 = tpu.matmul %46, %48, %cst_41 {dimension_numbers = #tpu.dot_dimension_numbers<[1], [0], [0], [1], [0, 0, 1, 1], [], []>} : vector<8x256xbf16>, vector<256x128xbf16>, vector<8x128xf32> -> vector<8x128xf32>
    %c3_42 = arith.constant 3 : index
    %c0_43 = arith.constant 0 : index
    %c0_44 = arith.constant 0 : index
    %50 = vector.load %arg6[%c3_42, %c0_43, %c0_44] : memref<4x1x128xf32, #tpu.memory_space<vmem>>, vector<1x1x128xf32>
    %51 = vector.shape_cast %50 : vector<1x1x128xf32> to vector<1x128xf32>
    %52 = vector.broadcast %51 : vector<1x128xf32> to vector<8x128xf32>
    %53 = arith.addf %49, %52 : vector<8x128xf32>
    %cst_45 = arith.constant 0.000000e+00 : f32
    %54 = vector.broadcast %cst_45 : f32 to vector<8x128xf32>
    %55 = arith.maximumf %53, %54 : vector<8x128xf32>
    %56 = arith.truncf %55 : vector<8x128xf32> to vector<8x128xbf16>
    %c0_46 = arith.constant 0 : index
    %c512_47 = arith.constant 512 : index
    %57 = vector.load %arg12[%c0_46, %c512_47] : memref<8x640xbf16, #tpu.memory_space<vmem>>, vector<8x128xbf16>
    tpu.vector_store %arg12[%c0_46, %c512_47], %56 {strides = array<i32>} : memref<8x640xbf16, #tpu.memory_space<vmem>>, vector<8x128xbf16>,
    %c0_48 = arith.constant 0 : index
    %c0_49 = arith.constant 0 : index
    %58 = vector.load %arg12[%c0_48, %c0_49] : memref<8x640xbf16, #tpu.memory_space<vmem>>, vector<8x640xbf16>
    %c0_50 = arith.constant 0 : index
    %c0_51 = arith.constant 0 : index
    %59 = vector.load %arg7[%c0_50, %c0_51] : memref<640x128xbf16, #tpu.memory_space<vmem>>, vector<640x128xbf16>
    %cst_52 = arith.constant dense<0.000000e+00> : vector<8x128xf32>
    %60 = tpu.matmul %58, %59, %cst_52 {dimension_numbers = #tpu.dot_dimension_numbers<[1], [0], [0], [1], [0, 0, 1, 1], [], []>} : vector<8x640xbf16>, vector<640x128xbf16>, vector<8x128xf32> -> vector<8x128xf32>
    %c0_53 = arith.constant 0 : index
    %c0_54 = arith.constant 0 : index
    %61 = vector.load %arg8[%c0_53, %c0_54] : memref<1x128xf32, #tpu.memory_space<vmem>>, vector<1x128xf32>
    %62 = vector.broadcast %61 : vector<1x128xf32> to vector<8x128xf32>
    %63 = arith.addf %60, %62 : vector<8x128xf32>
    %cst_55 = arith.constant 0.000000e+00 : f32
    %64 = vector.broadcast %cst_55 : f32 to vector<8x128xf32>
    %65 = arith.maximumf %63, %64 : vector<8x128xf32>
    %66 = arith.truncf %65 : vector<8x128xf32> to vector<8x128xbf16>
    %c0_56 = arith.constant 0 : index
    %c0_57 = arith.constant 0 : index
    %67 = vector.load %arg9[%c0_56, %c0_57] : memref<128x128xbf16, #tpu.memory_space<vmem>>, vector<128x128xbf16>
    %cst_58 = arith.constant dense<0.000000e+00> : vector<8x128xf32>
    %68 = tpu.matmul %66, %67, %cst_58 {dimension_numbers = #tpu.dot_dimension_numbers<[1], [0], [0], [1], [0, 0, 1, 1], [], []>} : vector<8x128xbf16>, vector<128x128xbf16>, vector<8x128xf32> -> vector<8x128xf32>
    %c0_59 = arith.constant 0 : index
    %c0_60 = arith.constant 0 : index
    %69 = vector.load %arg10[%c0_59, %c0_60] : memref<1x128xf32, #tpu.memory_space<vmem>>, vector<1x128xf32>
    %70 = vector.broadcast %69 : vector<1x128xf32> to vector<8x128xf32>
    %71 = arith.addf %68, %70 : vector<8x128xf32>
    %72 = arith.truncf %71 : vector<8x128xf32> to vector<8x128xbf16>
    %c0_61 = arith.constant 0 : index
    %c0_62 = arith.constant 0 : index
    %73 = vector.load %arg11[%c0_61, %c0_62] : memref<8x128xbf16, #tpu.memory_space<vmem>>, vector<8x128xbf16>
    tpu.vector_store %arg11[%c0_61, %c0_62], %72 {strides = array<i32>} : memref<8x128xbf16, #tpu.memory_space<vmem>>, vector<8x128xbf16>,
    return
  }
  func.func @transform_0(%arg0: i32) -> (i32, i32) {
    %c0_i32 = arith.constant 0 : i32
    %c0_i32_0 = arith.constant 0 : i32
    return %arg0, %c0_i32 : i32, i32
  }
  func.func @transform_1(%arg0: i32) -> (i32, i32) {
    %c0_i32 = arith.constant 0 : i32
    %c0_i32_0 = arith.constant 0 : i32
    return %arg0, %c0_i32 : i32, i32
  }
  func.func @transform_2(%arg0: i32) -> (i32, i32) {
    %c0_i32 = arith.constant 0 : i32
    %c0_i32_0 = arith.constant 0 : i32
    %c0_i32_1 = arith.constant 0 : i32
    return %c0_i32, %c0_i32_0 : i32, i32
  }
  func.func @transform_3(%arg0: i32) -> (i32, i32) {
    %c0_i32 = arith.constant 0 : i32
    %c0_i32_0 = arith.constant 0 : i32
    %c0_i32_1 = arith.constant 0 : i32
    return %c0_i32, %c0_i32_0 : i32, i32
  }
  func.func @transform_4(%arg0: i32) -> (i32, i32, i32) {
    %c0_i32 = arith.constant 0 : i32
    %c0_i32_0 = arith.constant 0 : i32
    %c0_i32_1 = arith.constant 0 : i32
    %c0_i32_2 = arith.constant 0 : i32
    return %c0_i32, %c0_i32_0, %c0_i32_1 : i32, i32, i32
  }
  func.func @transform_5(%arg0: i32) -> (i32, i32, i32) {
    %c0_i32 = arith.constant 0 : i32
    %c0_i32_0 = arith.constant 0 : i32
    %c0_i32_1 = arith.constant 0 : i32
    %c0_i32_2 = arith.constant 0 : i32
    return %c0_i32, %c0_i32_0, %c0_i32_1 : i32, i32, i32
  }
  func.func @transform_6(%arg0: i32) -> (i32, i32) {
    %c0_i32 = arith.constant 0 : i32
    %c0_i32_0 = arith.constant 0 : i32
    %c0_i32_1 = arith.constant 0 : i32
    return %c0_i32, %c0_i32_0 : i32, i32
  }
  func.func @transform_7(%arg0: i32) -> (i32, i32) {
    %c0_i32 = arith.constant 0 : i32
    %c0_i32_0 = arith.constant 0 : i32
    %c0_i32_1 = arith.constant 0 : i32
    return %c0_i32, %c0_i32_0 : i32, i32
  }
  func.func @transform_8(%arg0: i32) -> (i32, i32) {
    %c0_i32 = arith.constant 0 : i32
    %c0_i32_0 = arith.constant 0 : i32
    %c0_i32_1 = arith.constant 0 : i32
    return %c0_i32, %c0_i32_0 : i32, i32
  }
  func.func @transform_9(%arg0: i32) -> (i32, i32) {
    %c0_i32 = arith.constant 0 : i32
    %c0_i32_0 = arith.constant 0 : i32
    %c0_i32_1 = arith.constant 0 : i32
    return %c0_i32, %c0_i32_0 : i32, i32
  }
  func.func @transform_10(%arg0: i32) -> (i32, i32) {
    %c0_i32 = arith.constant 0 : i32
    %c0_i32_0 = arith.constant 0 : i32
    return %arg0, %c0_i32 : i32, i32
  }
}

</mosaic_0001>

<bundles_post_ra>
// kernel: _forward_impl.1
= control target key start
LH: loop header
LB: loop body
LE: loop exit
PB: predicated region body
PF: predicated region fallthrough
CT: control target
= control target key end

     0   :  { %15 = vsyncpa [#allocation4], 0  ;;  %s2359_s0 = inlined_call_operand.vmem [shape: bf16[8,256], index: 0, kind: input, shape index: {}]   ;;  %s2360_s1 = inlined_call_operand.vmem [shape: bf16[8,1024], index: 1, kind: input, shape index: {}]   ;;  %s2361_s2 = inlined_call_operand.vmem [shape: bf16[256,128], index: 2, kind: input, shape index: {}]   ;;  %s2362_s3 = inlined_call_operand.vmem [shape: f32[1,128], index: 3, kind: input, shape index: {}]   ;;  %s2363_s4 = inlined_call_operand.hbm [shape: bf16[4,256,128], index: 4, kind: input, shape index: {}]   ;;  %s2364_s5 = inlined_call_operand.vmem [shape: f32[4,1,128], index: 5, kind: input, shape index: {}]   ;;  %s2365_s6 = inlined_call_operand.hbm [shape: bf16[640,128], index: 6, kind: input, shape index: {}]   ;;  %s2366_s7 = inlined_call_operand.vmem [shape: f32[1,128], index: 7, kind: input, shape index: {}]   ;;  %s2367_s8 = inlined_call_operand.hbm [shape: bf16[128,128], index: 8, kind: input, shape index: {}]   ;;  %s2368_s9 = inlined_call_operand.vmem [shape: f32[1,128], index: 9, kind: input, shape index: {}]   ;;  %s2369_s10 = inlined_call_operand.vmem [shape: bf16[8,128], index: 10, kind: output, shape index: {}]  }
   0x1   :  { %16 = vsyncpa [#allocation6], 0  ;;  %s2181_s13 = smov [#allocation5]   ;;  %s2182_s15 = smov [#allocation3]  }
   0x2   :  { %s44_s14 = sshll.u32 %s2181_s13, 4  ;;  %s30_s16 = sshll.u32 %s2182_s15, 4  ;;  %s45_s14 = int_to_ptr.vmem [resolvable:$true] %s44_s14  ;;  %s31_s16 = int_to_ptr.vmem [resolvable:$true] %s30_s16 }
   0x3   :  { %s2125_s17 = scalar_lea.vmem %s45_s14, 5120  ;;  %p2130_p1 = scmp.lt.s32.totalorder %s45_s14, %s45_s14 }
   0x4   :  { %p2126_p0 = scmp.ne.s32.totalorder %s45_s14, %s2125_s17  ;;  %p2131_p2 = scmp.lt.s32.totalorder %s2125_s17, %s2125_s17 }
   0x6   :  { %p2132_p3 = por %p2131_p2, %p2130_p1 }
   0x8   :  { %p2133_p4 = pnand %p2132_p3, %p2126_p0 }
   0xa   :  { %2136 = shalt.err (!%p2133_p4)
}
   0xb   :  { %s2183_s18 = smov 64   ;;  %s2184_s19 = smov 4  }
   0xc   :  { %50 = dma.hbm_to_vmem [thread:$0]  %s2365_s6, 5120, %s45_s14, [#allocation6], %s2183_s18, %s2183_s18, %s2184_s19  }
   0xd   :  { %s2145_s22 = scalar_lea.vmem %s31_s16, 8192  ;;  %p2150_p6 = scmp.lt.s32.totalorder %s31_s16, %s31_s16 }
   0xe   :  { %p2146_p5 = scmp.ne.s32.totalorder %s31_s16, %s2145_s22  ;;  %p2151_p7 = scmp.lt.s32.totalorder %s2145_s22, %s2145_s22 }
  0x10   :  { %p2152_p8 = por %p2151_p7, %p2150_p6 }
  0x12   :  { %p2153_p9 = pnand %p2152_p8, %p2146_p5 }
  0x14   :  { %2156 = shalt.err (!%p2153_p9)
}
  0x15   :  { %36 = dma.hbm_to_vmem [thread:$0]  %s2363_s4, 8192, %s31_s16, [#allocation4], %s2183_s18, %s2183_s18, %s2184_s19  }
  0x16   :  { %s2185_s25 = smov [#allocation7]  }
  0x17   :  { %s58_s26 = sshll.u32 %s2185_s25, 4  ;;  %s59_s26 = int_to_ptr.vmem [resolvable:$true] %s58_s26 }
  0x18   :  { %s2165_s27 = scalar_lea.vmem %s59_s26, 1024  ;;  %p2170_p11 = scmp.lt.s32.totalorder %s59_s26, %s59_s26 }
  0x19   :  { %p2166_p10 = scmp.ne.s32.totalorder %s59_s26, %s2165_s27  ;;  %p2171_p12 = scmp.lt.s32.totalorder %s2165_s27, %s2165_s27 }
  0x1b   :  { %p2172_p13 = por %p2171_p12, %p2170_p11 }
  0x1d   :  { %p2173_p0 = pnand %p2172_p13, %p2166_p10 }
  0x1f   :  { %2176 = shalt.err (!%p2173_p0)
}
  0x20   :  { %64 = dma.hbm_to_vmem [thread:$0]  %s2367_s8, 1024, %s59_s26, [#allocation6], %s2183_s18, %s2183_s18, %s2184_s19  }
  0x21   :  { %2177 = dma.done.wait [#allocation4], 8192  }
  0x22   :  { %2178 = vsyncadd [#allocation4], 4294959104 }
  0x23   :  { %2179 = dma.done.wait [#allocation6], 6144  }
  0x24   :  { %2180 = vsyncadd [#allocation6], 4294961152  ;;  %v1974_v0 = vld [vmem:[%s2361_s2 + $0x78] sm:$0xff]   ;;  %v1975_v1 = vld [vmem:[#allocation3 + $0x78] sm:$0xff]   ;;  %vm2187_vm0 = vmmov 0  }
  0x25   :  { %1755 = vmatprep.subr.bf16.mxu0 %v1974_v0  ;;  %v1976_v2 = vld [vmem:[%s2361_s2 + $0x38] sm:$0xff]   ;;  %1777 = vmatprep.subr.bf16.mxu1 %v1975_v1  ;;  %v1977_v3 = vld [vmem:[#allocation3 + $0x38] sm:$0xff]   ;;  %v1979_v5 = vld [vmem:[#allocation3 + $0x70] sm:$0xff]  }
  0x26   :  { %1756 = vmatpush3.bf16.msra.mxu0 %v1976_v2  ;;  %v1978_v4 = vld [vmem:[%s2361_s2 + $0x70] sm:$0xff]   ;;  %1778 = vmatpush3.bf16.msra.mxu1 %v1977_v3  ;;  %v1981_v7 = vld [vmem:[#allocation3 + $0x30] sm:$0xff]   ;;  %v1983_v9 = vld [vmem:[#allocation3 + $0x68] sm:$0xff]  }
  0x27   :  { %1757 = vmatprep.subr.bf16.mxu0 %v1978_v4  ;;  %v1980_v6 = vld [vmem:[%s2361_s2 + $0x30] sm:$0xff]   ;;  %1779 = vmatprep.subr.bf16.mxu1 %v1979_v5  ;;  %v1982_v8 = vld [vmem:[%s2361_s2 + $0x68] sm:$0xff]   ;;  %v1985_v11 = vld [vmem:[#allocation3 + $0x28] sm:$0xff]  }
  0x28   :  { %v1984_v10 = vld [vmem:[%s2361_s2 + $0x28] sm:$0xff]   ;;  %v1986_v12 = vld [vmem:[%s2361_s2 + $0x60] sm:$0xff]   ;;  %v1987_v13 = vld [vmem:[#allocation3 + $0x60] sm:$0xff]  }
  0x29   :  { %v1988_v14 = vld [vmem:[%s2361_s2 + $0x20] sm:$0xff]   ;;  %v1989_v15 = vld [vmem:[#allocation3 + $0x20] sm:$0xff]   ;;  %v1991_v17 = vld [vmem:[#allocation3 + $0x58] sm:$0xff]  }
  0x2a   :  { %1758 = vmatpush3.bf16.msra.mxu0 %v1980_v6  ;;  %1780 = vmatpush3.bf16.msra.mxu1 %v1981_v7  ;;  %v1990_v16 = vld [vmem:[%s2361_s2 + $0x58] sm:$0xff]   ;;  %v1993_v19 = vld [vmem:[#allocation3 + $0x18] sm:$0xff]   ;;  %v1995_v21 = vld [vmem:[#allocation3 + $0x50] sm:$0xff]  }
  0x2b   :  { %1759 = vmatprep.subr.bf16.mxu0 %v1982_v8  ;;  %1781 = vmatprep.subr.bf16.mxu1 %v1983_v9  ;;  %v1992_v18 = vld [vmem:[%s2361_s2 + $0x18] sm:$0xff]   ;;  %v1994_v20 = vld [vmem:[%s2361_s2 + $0x50] sm:$0xff]   ;;  %v1997_v23 = vld [vmem:[#allocation3 + $0x10] sm:$0xff]  }
  0x2c   :  { %v1996_v22 = vld [vmem:[%s2361_s2 + $0x10] sm:$0xff]   ;;  %v1998_v24 = vld [vmem:[%s2361_s2 + $0x48] sm:$0xff]   ;;  %v1999_v25 = vld [vmem:[#allocation3 + $0x48] sm:$0xff]  }
  0x2d   :  { %v2000_v26 = vld [vmem:[%s2361_s2 + $0x8] sm:$0xff]   ;;  %v2001_v27 = vld [vmem:[#allocation3 + $0x8] sm:$0xff]   ;;  %v2003_v29 = vld [vmem:[#allocation3 + $0x40] sm:$0xff]  }
  0x2e   :  { %1760 = vmatpush3.bf16.msra.mxu0 %v1984_v10  ;;  %1782 = vmatpush3.bf16.msra.mxu1 %v1985_v11  ;;  %v2002_v28 = vld [vmem:[%s2361_s2 + $0x40] sm:$0xff]   ;;  %v2005_v31 = vld [vmem:[#allocation3] sm:$0xff]   ;;  %v2010_v38 = vld [vmem:[#allocation3 + $0xf8] sm:$0xff]  }
  0x2f   :  { %1761 = vmatprep.subr.bf16.mxu0 %v1986_v12  ;;  %1783 = vmatprep.subr.bf16.mxu1 %v1987_v13  ;;  %v2004_v30 = vld [vmem:[%s2361_s2] sm:$0xff]   ;;  %v2011_v39 = vld [vmem:[#allocation3 + $0x178] sm:$0xff]   ;;  %v2022_v50 = vld [vmem:[#allocation3 + $0xe0] sm:$0xff]  }
  0x30   :  { %v77_v32 = vld [vmem:[%s2359_s0] sm:$0xff]  ;;  %v2012_v40 = vld [vmem:[#allocation3 + $0xb8] sm:$0xff]   ;;  %v2023_v51 = vld [vmem:[#allocation3 + $0x160] sm:$0xff]  }
  0x31   :  { %v263_v33 = vld [vmem:[%s2360_s1] sm:$0xff]  ;;  %v1603_v34 = vcombine.low %v77_v32, %v77_v32  ;;  %v1604_v35 = vcombine.high %v77_v32, %v77_v32  ;;  %v2013_v41 = vld [vmem:[#allocation3 + $0x138] sm:$0xff]   ;;  %v2024_v52 = vld [vmem:[#allocation3 + $0xa0] sm:$0xff]  }
  0x32   :  { %1762 = vmatpush3.bf16.msra.mxu0 %v1988_v14  ;;  %1784 = vmatpush3.bf16.msra.mxu1 %v1989_v15  ;;  %v1622_v36 = vcombine.low %v263_v33, %v263_v33  ;;  %v1623_v37 = vcombine.high %v263_v33, %v263_v33  ;;  %v2014_v42 = vld [vmem:[#allocation3 + $0xf0] sm:$0xff]   ;;  %v2018_v46 = vld [vmem:[#allocation3 + $0xe8] sm:$0xff]   ;;  %v2025_v53 = vld [vmem:[#allocation3 + $0x120] sm:$0xff]  }
  0x33   :  { %1763 = vmatprep.subr.bf16.mxu0 %v1990_v16  ;;  %1785 = vmatprep.subr.bf16.mxu1 %v1991_v17  ;;  %v2015_v43 = vld [vmem:[#allocation3 + $0x170] sm:$0xff]   ;;  %v2019_v47 = vld [vmem:[#allocation3 + $0x168] sm:$0xff]   ;;  %v2026_v54 = vld [vmem:[#allocation3 + $0xd8] sm:$0xff]  }
  0x34   :  { %252 = vmatprep.mubr.bf16.mxu0 %v1604_v35  ;;  %438 = vmatprep.mubr.bf16.mxu1 %v1623_v37  ;;  %v2016_v44 = vld [vmem:[#allocation3 + $0xb0] sm:$0xff]   ;;  %v2020_v48 = vld [vmem:[#allocation3 + $0xa8] sm:$0xff]   ;;  %v2027_v55 = vld [vmem:[#allocation3 + $0x158] sm:$0xff]  }
  0x35   :  { %v2017_v45 = vld [vmem:[#allocation3 + $0x130] sm:$0xff]   ;;  %v2021_v49 = vld [vmem:[#allocation3 + $0x128] sm:$0xff]   ;;  %v2028_v56 = vld [vmem:[#allocation3 + $0x98] sm:$0xff]  }
  0x36   :  { %1764 = vmatpush3.bf16.msra.mxu0 %v1992_v18  ;;  %1786 = vmatpush3.bf16.msra.mxu1 %v1993_v19  ;;  %v2029_v57 = vld [vmem:[#allocation3 + $0x118] sm:$0xff]   ;;  %v2030_v58 = vld [vmem:[#allocation3 + $0xd0] sm:$0xff]   ;;  %v2034_v62 = vld [vmem:[#allocation3 + $0xc8] sm:$0xff]  }
  0x37   :  { %1765 = vmatprep.subr.bf16.mxu0 %v1994_v20  ;;  %1787 = vmatprep.subr.bf16.mxu1 %v1995_v21  ;;  %v2031_v59 = vld [vmem:[#allocation3 + $0x150] sm:$0xff]   ;;  %v2035_v63 = vld [vmem:[#allocation3 + $0x148] sm:$0xff]   ;;  %v2038_v2 = vld [vmem:[#allocation3 + $0xc0] sm:$0xff]  }
  0x38   :  { %v2032_v60 = vld [vmem:[#allocation3 + $0x90] sm:$0xff]   ;;  %v2036_v0 = vld [vmem:[#allocation3 + $0x88] sm:$0xff]   ;;  %v2039_v3 = vld [vmem:[#allocation3 + $0x140] sm:$0xff]  }
  0x39   :  { %v2033_v61 = vld [vmem:[#allocation3 + $0x110] sm:$0xff]   ;;  %v2037_v1 = vld [vmem:[#allocation3 + $0x108] sm:$0xff]   ;;  %v2040_v4 = vld [vmem:[#allocation3 + $0x80] sm:$0xff]  }
  0x3a   :  { %1766 = vmatpush3.bf16.msra.mxu0 %v1996_v22  ;;  %1788 = vmatpush3.bf16.msra.mxu1 %v1997_v23  ;;  %v2041_v5 = vld [vmem:[#allocation3 + $0x100] sm:$0xff]   ;;  %v449_v6 = vld [vmem:[%s2360_s1 + $0x8] sm:$0xff]  ;;  %v2050_v16 = vld [vmem:[#allocation3 + $0x1e8] sm:$0xff]  }
  0x3b   :  { %1767 = vmatprep.subr.bf16.mxu0 %v1998_v24  ;;  %1789 = vmatprep.subr.bf16.mxu1 %v1999_v25  ;;  %v1642_v7 = vcombine.low %v449_v6, %v449_v6  ;;  %v1643_v8 = vcombine.high %v449_v6, %v449_v6  ;;  %v637_v9 = vld [vmem:[%s2360_s1 + $0x10] sm:$0xff]  ;;  %v2048_v14 = vld [vmem:[#allocation3 + $0x1f0] sm:$0xff]   ;;  %v2051_v17 = vld [vmem:[#allocation3 + $0x1a8] sm:$0xff]  }
  0x3c   :  { %v1662_v10 = vcombine.low %v637_v9, %v637_v9  ;;  %v1663_v11 = vcombine.high %v637_v9, %v637_v9  ;;  %v2046_v12 = vld [vmem:[#allocation3 + $0x1f8] sm:$0xff]   ;;  %v2049_v15 = vld [vmem:[#allocation3 + $0x1b0] sm:$0xff]   ;;  %v2052_v18 = vld [vmem:[#allocation3 + $0x1e0] sm:$0xff]  }
  0x3d   :  { %v2047_v13 = vld [vmem:[#allocation3 + $0x1b8] sm:$0xff]   ;;  %v2053_v19 = vld [vmem:[#allocation3 + $0x1a0] sm:$0xff]   ;;  %v2056_v22 = vld [vmem:[#allocation3 + $0x1d0] sm:$0xff]  }
  0x3e   :  { %1768 = vmatpush3.bf16.msra.mxu0 %v2000_v26  ;;  %1790 = vmatpush3.bf16.msra.mxu1 %v2001_v27  ;;  %v2054_v20 = vld [vmem:[#allocation3 + $0x1d8] sm:$0xff]   ;;  %v825_v23 = vld [vmem:[%s2360_s1 + $0x18] sm:$0xff]  ;;  %v2057_v27 = vld [vmem:[#allocation3 + $0x190] sm:$0xff]  }
  0x3f   :  { %1769 = vmatprep.subr.bf16.mxu0 %v2002_v28  ;;  %1791 = vmatprep.subr.bf16.mxu1 %v2003_v29  ;;  %v2055_v21 = vld [vmem:[#allocation3 + $0x198] sm:$0xff]   ;;  %v1683_v24 = vcombine.high %v825_v23, %v825_v23  ;;  %v2066_v28 = vld [vmem:[#allocation5 + $0x70] sm:$0xff]   ;;  %v2058_v29 = vld [vmem:[#allocation3 + $0x1c8] sm:$0xff]  }
  0x40   :  { %v2064_v25 = vld [vmem:[#allocation5 + $0x78] sm:$0xff]   ;;  %v2069_v32 = vld [vmem:[#allocation5 + $0x28] sm:$0xff]   ;;  %v2061_v35 = vld [vmem:[#allocation3 + $0x180] sm:$0xff]  }
  0x41   :  { %v2065_v26 = vld [vmem:[#allocation5 + $0x38] sm:$0xff]   ;;  %v2059_v33 = vld [vmem:[#allocation3 + $0x188] sm:$0xff]   ;;  %v2070_v37 = vld [vmem:[#allocation5 + $0x60] sm:$0xff]  }
  0x42   :  { %1770 = vmatpush3.bf16.msra.mxu0 %v2004_v30  ;;  %1792 = vmatpush3.bf16.msra.mxu1 %v2005_v31  ;;  %v2067_v30 = vld [vmem:[#allocation5 + $0x30] sm:$0xff]   ;;  %v2068_v31 = vld [vmem:[#allocation5 + $0x68] sm:$0xff]  }
  0x43   :  { %1799 = vmatprep.subr.bf16.mxu0 %v2010_v38  ;;  %1821 = vmatprep.subr.bf16.mxu1 %v2011_v39  ;;  %v2071_v38 = vld [vmem:[#allocation5 + $0x20] sm:$0xff]   ;;  %v2072_v39 = vld [vmem:[#allocation5 + $0x58] sm:$0xff]  }
  0x45   :  { %253 = vmatmul.mubr.bf16.vlgmr.msra.gmra.mxu0 %v1603_v34  ;;  %439 = vmatmul.mubr.bf16.vlgmr.msra.gmra.mxu1 %v1622_v36  ;;  %v2060_v34 = vld [vmem:[#allocation3 + $0x1c0] sm:$0xff]   ;;  %v1682_v36 = vcombine.low %v825_v23, %v825_v23  ;;  %v2102_v23 = vld [vmem:[#allocation5 + $0x128] sm:$0xff]  }
  0x46   :  { %1800 = vmatpush3.bf16.msra.mxu0 %v2012_v40  ;;  %1822 = vmatpush3.bf16.msra.mxu1 %v2013_v41  ;;  %v2073_v40 = vld [vmem:[#allocation5 + $0x18] sm:$0xff]   ;;  %v2074_v41 = vld [vmem:[#allocation5 + $0x50] sm:$0xff]  }
  0x47   :  { %1801 = vmatprep.subr.bf16.mxu0 %v2014_v42  ;;  %1823 = vmatprep.subr.bf16.mxu1 %v2015_v43  ;;  %v2075_v42 = vld [vmem:[#allocation5 + $0x10] sm:$0xff]   ;;  %v2076_v43 = vld [vmem:[#allocation5 + $0x48] sm:$0xff]  }
  0x48   :  { %626 = vmatprep.mubr.bf16.mxu0 %v1643_v8  ;;  %814 = vmatprep.mubr.bf16.mxu1 %v1663_v11 }
  0x4a   :  { %1802 = vmatpush3.bf16.msra.mxu0 %v2016_v44  ;;  %1824 = vmatpush3.bf16.msra.mxu1 %v2017_v45  ;;  %v2077_v44 = vld [vmem:[#allocation5 + $0x8] sm:$0xff]   ;;  %v2078_v45 = vld [vmem:[#allocation5 + $0x40] sm:$0xff]  }
  0x4b   :  { %1803 = vmatprep.subr.bf16.mxu0 %v2018_v46  ;;  %1825 = vmatprep.subr.bf16.mxu1 %v2019_v47  ;;  %v2079_v46 = vld [vmem:[#allocation5] sm:$0xff]   ;;  %v2082_v47 = vld [vmem:[#allocation5 + $0xf8] sm:$0xff]  }
  0x4e   :  { %1804 = vmatpush3.bf16.msra.mxu0 %v2020_v48  ;;  %1826 = vmatpush3.bf16.msra.mxu1 %v2021_v49  ;;  %v2083_v48 = vld [vmem:[#allocation5 + $0xb8] sm:$0xff]   ;;  %v2084_v49 = vld [vmem:[#allocation5 + $0xf0] sm:$0xff]  }
  0x4f   :  { %1805 = vmatprep.subr.bf16.mxu0 %v2022_v50  ;;  %1827 = vmatprep.subr.bf16.mxu1 %v2023_v51  ;;  %v2085_v50 = vld [vmem:[#allocation5 + $0xb0] sm:$0xff]   ;;  %v2086_v51 = vld [vmem:[#allocation5 + $0xe8] sm:$0xff]  }
  0x52   :  { %1806 = vmatpush3.bf16.msra.mxu0 %v2024_v52  ;;  %1828 = vmatpush3.bf16.msra.mxu1 %v2025_v53  ;;  %v2087_v52 = vld [vmem:[#allocation5 + $0xa8] sm:$0xff]   ;;  %v2088_v53 = vld [vmem:[#allocation5 + $0xe0] sm:$0xff]  }
  0x53   :  { %1807 = vmatprep.subr.bf16.mxu0 %v2026_v54  ;;  %1829 = vmatprep.subr.bf16.mxu1 %v2027_v55  ;;  %v2089_v54 = vld [vmem:[#allocation5 + $0xa0] sm:$0xff]   ;;  %v2090_v55 = vld [vmem:[#allocation5 + $0xd8] sm:$0xff]  }
  0x56   :  { %1808 = vmatpush3.bf16.msra.mxu0 %v2028_v56  ;;  %1830 = vmatpush3.bf16.msra.mxu1 %v2029_v57  ;;  %v2091_v56 = vld [vmem:[#allocation5 + $0x98] sm:$0xff]   ;;  %v2092_v57 = vld [vmem:[#allocation5 + $0xd0] sm:$0xff]  }
  0x57   :  { %1809 = vmatprep.subr.bf16.mxu0 %v2030_v58  ;;  %1831 = vmatprep.subr.bf16.mxu1 %v2031_v59  ;;  %v2093_v58 = vld [vmem:[#allocation5 + $0x90] sm:$0xff]   ;;  %v2094_v59 = vld [vmem:[#allocation5 + $0xc8] sm:$0xff]  }
  0x5a   :  { %1810 = vmatpush3.bf16.msra.mxu0 %v2032_v60  ;;  %1832 = vmatpush3.bf16.msra.mxu1 %v2033_v61  ;;  %v2095_v60 = vld [vmem:[#allocation5 + $0x88] sm:$0xff]   ;;  %v2096_v61 = vld [vmem:[#allocation5 + $0xc0] sm:$0xff]  }
  0x5b   :  { %1811 = vmatprep.subr.bf16.mxu0 %v2034_v62  ;;  %1833 = vmatprep.subr.bf16.mxu1 %v2035_v63  ;;  %v2097_v62 = vld [vmem:[#allocation5 + $0x80] sm:$0xff]   ;;  %v2186_v63 = vmov 0.0  }
  0x5e   :  { %1812 = vmatpush3.bf16.msra.mxu0 %v2036_v0  ;;  %1834 = vmatpush3.bf16.msra.mxu1 %v2037_v1 }
  0x5f   :  { %1813 = vmatprep.subr.bf16.mxu0 %v2038_v2  ;;  %1835 = vmatprep.subr.bf16.mxu1 %v2039_v3  ;;  %v1602_v2 = vld [vmem:[%s2362_s3] ss:$0 sm:$0xff] }
  0x62   :  { %1814 = vmatpush3.bf16.msra.mxu0 %v2040_v4  ;;  %1836 = vmatpush3.bf16.msra.mxu1 %v2041_v5  ;;  %v1621_v4 = vld [vmem:[%s2364_s5] ss:$0 sm:$0xff] }
  0x63   :  { %1843 = vmatprep.subr.bf16.mxu0 %v2046_v12  ;;  %1865 = vmatprep.subr.bf16.mxu1 %v2064_v25 }
  0x65   :  { %627 = vmatmul.mubr.bf16.vlgmr.msra.gmra.mxu0 %v1642_v7  ;;  %815 = vmatmul.mubr.bf16.vlgmr.msra.gmra.mxu1 %v1662_v10 }
  0x66   :  { %1844 = vmatpush3.bf16.msra.mxu0 %v2047_v13  ;;  %1002 = vmatprep.mubr.bf16.mxu0 %v1683_v24  ;;  %v2103_v24 = vld [vmem:[#allocation5 + $0x120] sm:$0xff]  }
  0x67   :  { %1845 = vmatprep.subr.bf16.mxu0 %v2048_v14  ;;  %1866 = vmatpush3.bf16.msra.mxu1 %v2065_v26 }
  0x68   :  { %1867 = vmatprep.subr.bf16.mxu1 %v2066_v28 }
  0x6a   :  { %1846 = vmatpush3.bf16.msra.mxu0 %v2049_v15 }
  0x6b   :  { %1847 = vmatprep.subr.bf16.mxu0 %v2050_v16  ;;  %1868 = vmatpush3.bf16.msra.mxu1 %v2067_v30 }
  0x6c   :  { %1869 = vmatprep.subr.bf16.mxu1 %v2068_v31  ;;  %v2104_v31 = vld [vmem:[#allocation5 + $0x118] sm:$0xff]  }
  0x6e   :  { %1848 = vmatpush3.bf16.msra.mxu0 %v2051_v17 }
  0x6f   :  { %1849 = vmatprep.subr.bf16.mxu0 %v2052_v18  ;;  %1870 = vmatpush3.bf16.msra.mxu1 %v2069_v32 }
  0x70   :  { %1871 = vmatprep.subr.bf16.mxu1 %v2070_v37 }
  0x72   :  { %1850 = vmatpush3.bf16.msra.mxu0 %v2053_v19 }
  0x73   :  { %1851 = vmatprep.subr.bf16.mxu0 %v2054_v20  ;;  %1872 = vmatpush3.bf16.msra.mxu1 %v2071_v38 }
  0x74   :  { %1873 = vmatprep.subr.bf16.mxu1 %v2072_v39 }
  0x76   :  { %1852 = vmatpush3.bf16.msra.mxu0 %v2055_v21  ;;  %v2100_v21 = vld [vmem:[#allocation5 + $0x138] sm:$0xff]  }
  0x77   :  { %1853 = vmatprep.subr.bf16.mxu0 %v2056_v22  ;;  %1874 = vmatpush3.bf16.msra.mxu1 %v2073_v40  ;;  %v2101_v22 = vld [vmem:[#allocation5 + $0x130] sm:$0xff]  }
  0x78   :  { %1875 = vmatprep.subr.bf16.mxu1 %v2074_v41  ;;  %v2105_v40 = vld [vmem:[#allocation5 + $0x110] sm:$0xff]  }
  0x7a   :  { %1854 = vmatpush3.bf16.msra.mxu0 %v2057_v27  ;;  %v1641_v27 = vld [vmem:[%s2364_s5 + $0x1] ss:$0 sm:$0xff] }
  0x7b   :  { %1855 = vmatprep.subr.bf16.mxu0 %v2058_v29  ;;  %1876 = vmatpush3.bf16.msra.mxu1 %v2075_v42  ;;  %v1661_v29 = vld [vmem:[%s2364_s5 + $0x2] ss:$0 sm:$0xff] }
  0x7c   :  { %1877 = vmatprep.subr.bf16.mxu1 %v2076_v43 }
  0x7e   :  { %1856 = vmatpush3.bf16.msra.mxu0 %v2059_v33 }
  0x7f   :  { %1857 = vmatprep.subr.bf16.mxu0 %v2060_v34  ;;  %1878 = vmatpush3.bf16.msra.mxu1 %v2077_v44 }
  0x80   :  { %1879 = vmatprep.subr.bf16.mxu1 %v2078_v45  ;;  %v2106_v45 = vld [vmem:[#allocation5 + $0x108] sm:$0xff]  }
  0x82   :  { %1858 = vmatpush3.bf16.msra.mxu0 %v2061_v35 }
  0x83   :  { %1880 = vmatpush3.bf16.msra.mxu1 %v2079_v46  ;;  %1887 = vmatprep.subr.bf16.mxu0 %v2082_v47  ;;  %v2107_v46 = vld [vmem:[#allocation5 + $0x100] sm:$0xff]  }
  0x84   :  { %1927 = vmatprep.subr.bf16.mxu1 %v2186_v63 }
  0x85   :  { %1003 = vmatmul.mubr.bf16.vlgmr.msra.gmra.mxu0 %v1682_v36 }
  0x86   :  { %1888 = vmatpush3.bf16.msra.mxu0 %v2083_v48 }
  0x87   :  { %1889 = vmatprep.subr.bf16.mxu0 %v2084_v49 }
  0x8a   :  { %1890 = vmatpush3.bf16.msra.mxu0 %v2085_v50 }
  0x8b   :  { %1891 = vmatprep.subr.bf16.mxu0 %v2086_v51  ;;  %v1681_v51 = vld [vmem:[%s2364_s5 + $0x3] ss:$0 sm:$0xff] }
  0x8e   :  { %1892 = vmatpush3.bf16.msra.mxu0 %v2087_v52 }
  0x8f   :  { %1893 = vmatprep.subr.bf16.mxu0 %v2088_v53 }
  0x92   :  { %1894 = vmatpush3.bf16.msra.mxu0 %v2089_v54 }
  0x93   :  { %1895 = vmatprep.subr.bf16.mxu0 %v2090_v55 }
  0x96   :  { %1896 = vmatpush3.bf16.msra.mxu0 %v2091_v56 }
  0x97   :  { %1897 = vmatprep.subr.bf16.mxu0 %v2092_v57 }
  0x9a   :  { %1898 = vmatpush3.bf16.msra.mxu0 %v2093_v58 }
  0x9b   :  { %1899 = vmatprep.subr.bf16.mxu0 %v2094_v59 }
  0x9e   :  { %1900 = vmatpush3.bf16.msra.mxu0 %v2095_v60  ;;  %v2109_v60 = vld [vmem:[#allocation7 + $0x38] sm:$0xff]  }
  0x9f   :  { %1901 = vmatprep.subr.bf16.mxu0 %v2096_v61  ;;  %v2110_v61 = vld [vmem:[#allocation7 + $0x30] sm:$0xff]  }
  0xa2   :  { %1902 = vmatpush3.bf16.msra.mxu0 %v2097_v62  ;;  %v2111_v62 = vld [vmem:[#allocation7 + $0x28] sm:$0xff]  }
  0xa3   :  { %1947 = vmatprep.subr.bf16.mxu0 %v2186_v63 }
 0x105   :  { %v1771_v0 = vpop.f32.mrf.mxu0  ;;  %v1793_v1 = vpop.f32.mrf.mxu1 }
 0x107   :  { %v1772_v3 = vpop.f32.mrf.mxu0  ;;  %v1794_v5 = vpop.f32.mrf.mxu1 }
 0x108   :  { %v1773_v6 = vadd.f32 %v1772_v3, %v1771_v0  ;;  %v1795_v7 = vadd.f32 %v1794_v5, %v1793_v1  ;;  %v2112_v0 = vld [vmem:[#allocation7 + $0x20] sm:$0xff]   ;;  %v2113_v1 = vld [vmem:[#allocation7 + $0x18] sm:$0xff]   ;;  %v2115_v3 = vld [vmem:[#allocation7 + $0x8] sm:$0xff]  }
 0x109   :  { %v1774_v8 = vpop.f32.mrf.mxu0  ;;  %v1796_v9 = vpop.f32.mrf.mxu1 }
 0x10a   :  { %v255_v10 = vadd.f32 %v1773_v6, %v1602_v2  ;;  %v441_v11 = vadd.f32 %v1795_v7, %v1621_v4  ;;  %v2114_v2 = vld [vmem:[#allocation7 + $0x10] sm:$0xff]   ;;  %v2116_v4 = vld [vmem:[#allocation7] sm:$0xff]  }
 0x10b   :  { %v1775_v12 = vpop.f32.mrf.mxu0  ;;  %v1797_v13 = vpop.f32.mrf.mxu1 }
 0x10c   :  { %v260_v14 = vmax.f32 %v255_v10, 0.0  ;;  %v446_v15 = vmax.f32 %v441_v11, 0.0 }
 0x10e   :  { %v261_v16 = vpack.c.bf16 %v260_v14, %v260_v14  ;;  %v447_v17 = vpack.c.bf16 %v446_v15, %v446_v15  ;;  %v1700_v14 = vld [vmem:[%s2366_s7] ss:$0 sm:$0xff] }
 0x110   :  { %262 = vst [vmem:[#allocation2] sm:$0xf] %v261_v16  ;;  %448 = vst [vmem:[#allocation2 + $0x4] sm:$0xf] %v447_v17 }
 0x117   :  { %v1013_v18 = vld [vmem:[#allocation2] sm:$0xff] }
 0x118   :  { %v1701_v19 = vcombine.low %v1013_v18, %v1013_v18  ;;  %v1702_v20 = vcombine.high %v1013_v18, %v1013_v18 }
 0x11a   :  { %1393 = vmatprep.mubr.bf16.mxu1 %v1702_v20 }
 0x11b   :  { %1394 = vmatmul.mubr.bf16.vlgmr.msra.gmra.mxu1 %v1701_v19 }
 0x11c   :  { %1928 = vmatpush3.bf16.msra.mxu1 %v2100_v21  ;;  %1943 = vmatprep.mubr.msk.bf16.mxu1 %vm2187_vm0, %v2186_v63 }
 0x11d   :  { %1929 = vmatprep.subr.bf16.mxu1 %v2186_v63 }
 0x120   :  { %1930 = vmatpush3.bf16.msra.mxu1 %v2101_v22 }
 0x121   :  { %1931 = vmatprep.subr.bf16.mxu1 %v2186_v63 }
 0x124   :  { %1932 = vmatpush3.bf16.msra.mxu1 %v2102_v23 }
 0x125   :  { %1933 = vmatprep.subr.bf16.mxu1 %v2186_v63  ;;  %v1815_v25 = vpop.f32.mrf.mxu0  ;;  %v1837_v26 = vpop.f32.mrf.mxu1 }
 0x127   :  { %v1816_v28 = vpop.f32.mrf.mxu0  ;;  %v1838_v30 = vpop.f32.mrf.mxu1 }
 0x128   :  { %1934 = vmatpush3.bf16.msra.mxu1 %v2103_v24  ;;  %v1817_v32 = vadd.f32 %v1816_v28, %v1815_v25  ;;  %v1839_v33 = vadd.f32 %v1838_v30, %v1837_v26  ;;  %v1746_v24 = vld [vmem:[%s2368_s9] ss:$0 sm:$0xff] }
 0x129   :  { %1935 = vmatprep.subr.bf16.mxu1 %v2186_v63  ;;  %v1818_v34 = vpop.f32.mrf.mxu0  ;;  %v1840_v35 = vpop.f32.mrf.mxu1 }
 0x12a   :  { %v629_v36 = vadd.f32 %v1817_v32, %v1641_v27  ;;  %v817_v37 = vadd.f32 %v1839_v33, %v1661_v29 }
 0x12b   :  { %v1819_v38 = vpop.f32.mrf.mxu0  ;;  %v1841_v39 = vpop.f32.mrf.mxu1 }
 0x12c   :  { %1936 = vmatpush3.bf16.msra.mxu1 %v2104_v31  ;;  %v634_v41 = vmax.f32 %v629_v36, 0.0  ;;  %v822_v42 = vmax.f32 %v817_v37, 0.0 }
 0x12d   :  { %1937 = vmatprep.subr.bf16.mxu1 %v2186_v63 }
 0x12e   :  { %v635_v43 = vpack.c.bf16 %v634_v41, %v634_v41  ;;  %v823_v44 = vpack.c.bf16 %v822_v42, %v822_v42 }
 0x130   :  { %1938 = vmatpush3.bf16.msra.mxu1 %v2105_v40  ;;  %636 = vst [vmem:[#allocation2 + $0x8] sm:$0xf] %v635_v43  ;;  %824 = vst [vmem:[#allocation2 + $0xc] sm:$0xf] %v823_v44 }
 0x131   :  { %1939 = vmatprep.subr.bf16.mxu1 %v2186_v63 }
 0x134   :  { %1940 = vmatpush3.bf16.msra.mxu1 %v2106_v45 }
 0x135   :  { %1941 = vmatprep.subr.bf16.mxu1 %v2186_v63 }
 0x137   :  { %v1014_v47 = vld [vmem:[#allocation2 + $0x8] sm:$0xff] }
 0x138   :  { %1942 = vmatpush3.bf16.msra.mxu1 %v2107_v46  ;;  %v1703_v48 = vcombine.low %v1014_v47, %v1014_v47  ;;  %v1704_v49 = vcombine.high %v1014_v47, %v1014_v47 }
 0x13a   :  { %1433 = vmatprep.mubr.bf16.mxu0 %v1704_v49 }
 0x13b   :  { %1434 = vmatmul.mubr.bf16.vlgmr.msra.gmra.mxu0 %v1703_v48 }
 0x13c   :  { %1963 = vmatprep.mubr.msk.bf16.mxu0 %vm2187_vm0, %v2186_v63  ;;  %1948 = vmatpush3.bf16.msra.mxu0 %v2109_v60 }
 0x13d   :  { %1949 = vmatprep.subr.bf16.mxu0 %v2186_v63 }
 0x140   :  { %1950 = vmatpush3.bf16.msra.mxu0 %v2110_v61 }
 0x141   :  { %1951 = vmatprep.subr.bf16.mxu0 %v2186_v63 }
 0x144   :  { %1952 = vmatpush3.bf16.msra.mxu0 %v2111_v62 }
 0x145   :  { %v1859_v50 = vpop.f32.mrf.mxu0  ;;  %1953 = vmatprep.subr.bf16.mxu0 %v2186_v63 }
 0x147   :  { %v1860_v52 = vpop.f32.mrf.mxu0 }
 0x148   :  { %v1861_v53 = vadd.f32 %v1860_v52, %v1859_v50  ;;  %1954 = vmatpush3.bf16.msra.mxu0 %v2112_v0 }
 0x149   :  { %v1862_v54 = vpop.f32.mrf.mxu0  ;;  %1955 = vmatprep.subr.bf16.mxu0 %v2186_v63 }
 0x14a   :  { %v1005_v55 = vadd.f32 %v1861_v53, %v1681_v51 }
 0x14b   :  { %v1863_v56 = vpop.f32.mrf.mxu0 }
 0x14c   :  { %v1010_v57 = vmax.f32 %v1005_v55, 0.0  ;;  %1956 = vmatpush3.bf16.msra.mxu0 %v2113_v1 }
 0x14d   :  { %1957 = vmatprep.subr.bf16.mxu0 %v2186_v63 }
 0x14e   :  { %v1011_v58 = vpack.c.bf16 %v1010_v57, %v1010_v57 }
 0x150   :  { %1012 = vst [vmem:[#allocation2 + $0x10] sm:$0xf] %v1011_v58  ;;  %1958 = vmatpush3.bf16.msra.mxu0 %v2114_v2 }
 0x151   :  { %1959 = vmatprep.subr.bf16.mxu0 %v2186_v63 }
 0x154   :  { %1960 = vmatpush3.bf16.msra.mxu0 %v2115_v3 }
 0x155   :  { %1961 = vmatprep.subr.bf16.mxu0 %v2186_v63 }
 0x157   :  { %v2108_v59 = vld [vmem:[#allocation2 + $0x10] ss:$0 sps:$4 sm:$0xff]  }
 0x158   :  { %1944 = vmatmul.mubr.bf16.vlgmr.msra.gmra.mxu1 %v2108_v59  ;;  %1962 = vmatpush3.bf16.msra.mxu0 %v2116_v4 }
 0x1db   :  { %v1881_v5 = vpop.f32.mrf.mxu1 }
 0x1dd   :  { %v1882_v6 = vpop.f32.mrf.mxu1 }
 0x1de   :  { %v1883_v13 = vadd.f32 %v1882_v6, %v1881_v5 }
 0x1df   :  { %v1884_v7 = vpop.f32.mrf.mxu1 }
 0x1e0   :  { %v1396_v16 = vadd.f32 %v1883_v13, %v1700_v14 }
 0x1e1   :  { %v1885_v8 = vpop.f32.mrf.mxu1 }
 0x1fb   :  { %v1903_v9 = vpop.f32.mrf.mxu0 }
 0x1fd   :  { %v1904_v10 = vpop.f32.mrf.mxu0 }
 0x1fe   :  { %v1905_v15 = vadd.f32 %v1904_v10, %v1903_v9 }
 0x1ff   :  { %v1906_v11 = vpop.f32.mrf.mxu0 }
 0x200   :  { %v1436_v17 = vadd.f32 %v1905_v15, %v1396_v16 }
 0x201   :  { %v1907_v12 = vpop.f32.mrf.mxu0 }
 0x218   :  { %v1475_v18 = vpop.f32.mrf.mxu1 }
 0x219   :  { %v1476_v63 = vadd.f32 %v1475_v18, %v1436_v17 }
 0x21a   :  { %v1945_v19 = vpop.f32.mrf.mxu1 }
 0x21b   :  { %v1481_v20 = vmax.f32 %v1476_v63, 0.0 }
 0x21c   :  { %v1478_v21 = vpop.f32.mrf.mxu1 }
 0x21d   :  { %v1482_v22 = vpack.c.bf16 %v1481_v20, %v1481_v20 }
 0x21e   :  { %v1946_v23 = vpop.f32.mrf.mxu1 }
 0x21f   :  { %1964 = vmatmul.mubr.bf16.vlgmr.msra.gmra.mxu0 %v1482_v22 }
 0x2df   :  { %v1588_v25 = vpop.f32.mrf.mxu0 }
 0x2e0   :  { %v1589_v26 = vadd.f32 %v1746_v24, %v1588_v25 }
 0x2e1   :  { %v1965_v27 = vpop.f32.mrf.mxu0 }
 0x2e2   :  { %v1594_v28 = vpack.c.bf16 %v1589_v26, %v1589_v26 }
 0x2e3   :  { %v1591_v29 = vpop.f32.mrf.mxu0 }
 0x2e4   :  { %1595 = vst [vmem:[%s2369_s10] sm:$0xf] %v1594_v28 }
 0x2e5   :  { %v1966_v30 = vpop.f32.mrf.mxu0 }
 0x2e6   :  { %1600 = vsyncpa [#allocation4], 1 }
 0x2e7   :  { %1601 = vsyncpa [#allocation6], 1 }

// kernel: _forward_impl.1
= control target key start
LH: loop header
LB: loop body
LE: loop exit
PB: predicated region body
PF: predicated region fallthrough
CT: control target
= control target key end

     0   :  { %15 = vsyncpa [#allocation4], 0  ;;  %s2359_s0 = inlined_call_operand.vmem [shape: bf16[8,256], index: 0, kind: input, shape index: {}]   ;;  %s2360_s1 = inlined_call_operand.vmem [shape: bf16[8,1024], index: 1, kind: input, shape index: {}]   ;;  %s2361_s2 = inlined_call_operand.vmem [shape: bf16[256,128], index: 2, kind: input, shape index: {}]   ;;  %s2362_s3 = inlined_call_operand.vmem [shape: f32[1,128], index: 3, kind: input, shape index: {}]   ;;  %s2363_s4 = inlined_call_operand.hbm [shape: bf16[4,256,128], index: 4, kind: input, shape index: {}]   ;;  %s2364_s5 = inlined_call_operand.vmem [shape: f32[4,1,128], index: 5, kind: input, shape index: {}]   ;;  %s2365_s6 = inlined_call_operand.hbm [shape: bf16[640,128], index: 6, kind: input, shape index: {}]   ;;  %s2366_s7 = inlined_call_operand.vmem [shape: f32[1,128], index: 7, kind: input, shape index: {}]   ;;  %s2367_s8 = inlined_call_operand.hbm [shape: bf16[128,128], index: 8, kind: input, shape index: {}]   ;;  %s2368_s9 = inlined_call_operand.vmem [shape: f32[1,128], index: 9, kind: input, shape index: {}]   ;;  %s2369_s10 = inlined_call_operand.vmem [shape: bf16[8,128], index: 10, kind: output, shape index: {}]  }
   0x1   :  { %16 = vsyncpa [#allocation6], 0  ;;  %s2181_s13 = smov [#allocation5]   ;;  %s2182_s15 = smov [#allocation3]  }
   0x2   :  { %s44_s14 = sshll.u32 %s2181_s13, 4  ;;  %s30_s16 = sshll.u32 %s2182_s15, 4  ;;  %s45_s14 = int_to_ptr.vmem [resolvable:$true] %s44_s14  ;;  %s31_s16 = int_to_ptr.vmem [resolvable:$true] %s30_s16 }
   0x3   :  { %s2125_s17 = scalar_lea.vmem %s45_s14, 5120  ;;  %p2130_p1 = scmp.lt.s32.totalorder %s45_s14, %s45_s14 }
   0x4   :  { %p2126_p0 = scmp.ne.s32.totalorder %s45_s14, %s2125_s17  ;;  %p2131_p2 = scmp.lt.s32.totalorder %s2125_s17, %s2125_s17 }
   0x6   :  { %p2132_p3 = por %p2131_p2, %p2130_p1 }
   0x8   :  { %p2133_p4 = pnand %p2132_p3, %p2126_p0 }
   0xa   :  { %2136 = shalt.err (!%p2133_p4)
}
   0xb   :  { %s2183_s18 = smov 64   ;;  %s2184_s19 = smov 4  }
   0xc   :  { %50 = dma.hbm_to_vmem [thread:$0]  %s2365_s6, 5120, %s45_s14, [#allocation6], %s2183_s18, %s2183_s18, %s2184_s19  }
   0xd   :  { %s2145_s22 = scalar_lea.vmem %s31_s16, 8192  ;;  %p2150_p6 = scmp.lt.s32.totalorder %s31_s16, %s31_s16 }
   0xe   :  { %p2146_p5 = scmp.ne.s32.totalorder %s31_s16, %s2145_s22  ;;  %p2151_p7 = scmp.lt.s32.totalorder %s2145_s22, %s2145_s22 }
  0x10   :  { %p2152_p8 = por %p2151_p7, %p2150_p6 }
  0x12   :  { %p2153_p9 = pnand %p2152_p8, %p2146_p5 }
  0x14   :  { %2156 = shalt.err (!%p2153_p9)
}
  0x15   :  { %36 = dma.hbm_to_vmem [thread:$0]  %s2363_s4, 8192, %s31_s16, [#allocation4], %s2183_s18, %s2183_s18, %s2184_s19  }
  0x16   :  { %s2185_s25 = smov [#allocation7]  }
  0x17   :  { %s58_s26 = sshll.u32 %s2185_s25, 4  ;;  %s59_s26 = int_to_ptr.vmem [resolvable:$true] %s58_s26 }
  0x18   :  { %s2165_s27 = scalar_lea.vmem %s59_s26, 1024  ;;  %p2170_p11 = scmp.lt.s32.totalorder %s59_s26, %s59_s26 }
  0x19   :  { %p2166_p10 = scmp.ne.s32.totalorder %s59_s26, %s2165_s27  ;;  %p2171_p12 = scmp.lt.s32.totalorder %s2165_s27, %s2165_s27 }
  0x1b   :  { %p2172_p13 = por %p2171_p12, %p2170_p11 }
  0x1d   :  { %p2173_p0 = pnand %p2172_p13, %p2166_p10 }
  0x1f   :  { %2176 = shalt.err (!%p2173_p0)
}
  0x20   :  { %64 = dma.hbm_to_vmem [thread:$0]  %s2367_s8, 1024, %s59_s26, [#allocation6], %s2183_s18, %s2183_s18, %s2184_s19  }
  0x21   :  { %2177 = dma.done.wait [#allocation4], 8192  }
  0x22   :  { %2178 = vsyncadd [#allocation4], 4294959104 }
  0x23   :  { %2179 = dma.done.wait [#allocation6], 6144  }
  0x24   :  { %2180 = vsyncadd [#allocation6], 4294961152  ;;  %v1974_v0 = vld [vmem:[%s2361_s2 + $0x78] sm:$0xff]   ;;  %v1975_v1 = vld [vmem:[#allocation3 + $0x78] sm:$0xff]   ;;  %vm2187_vm0 = vmmov 0  }
  0x25   :  { %1755 = vmatprep.subr.bf16.mxu0 %v1974_v0  ;;  %v1976_v2 = vld [vmem:[%s2361_s2 + $0x38] sm:$0xff]   ;;  %1777 = vmatprep.subr.bf16.mxu1 %v1975_v1  ;;  %v1977_v3 = vld [vmem:[#allocation3 + $0x38] sm:$0xff]   ;;  %v1979_v5 = vld [vmem:[#allocation3 + $0x70] sm:$0xff]  }
  0x26   :  { %1756 = vmatpush3.bf16.msra.mxu0 %v1976_v2  ;;  %v1978_v4 = vld [vmem:[%s2361_s2 + $0x70] sm:$0xff]   ;;  %1778 = vmatpush3.bf16.msra.mxu1 %v1977_v3  ;;  %v1981_v7 = vld [vmem:[#allocation3 + $0x30] sm:$0xff]   ;;  %v1983_v9 = vld [vmem:[#allocation3 + $0x68] sm:$0xff]  }
  0x27   :  { %1757 = vmatprep.subr.bf16.mxu0 %v1978_v4  ;;  %v1980_v6 = vld [vmem:[%s2361_s2 + $0x30] sm:$0xff]   ;;  %1779 = vmatprep.subr.bf16.mxu1 %v1979_v5  ;;  %v1982_v8 = vld [vmem:[%s2361_s2 + $0x68] sm:$0xff]   ;;  %v1985_v11 = vld [vmem:[#allocation3 + $0x28] sm:$0xff]  }
  0x28   :  { %v1984_v10 = vld [vmem:[%s2361_s2 + $0x28] sm:$0xff]   ;;  %v1986_v12 = vld [vmem:[%s2361_s2 + $0x60] sm:$0xff]   ;;  %v1987_v13 = vld [vmem:[#allocation3 + $0x60] sm:$0xff]  }
  0x29   :  { %v1988_v14 = vld [vmem:[%s2361_s2 + $0x20] sm:$0xff]   ;;  %v1989_v15 = vld [vmem:[#allocation3 + $0x20] sm:$0xff]   ;;  %v1991_v17 = vld [vmem:[#allocation3 + $0x58] sm:$0xff]  }
  0x2a   :  { %1758 = vmatpush3.bf16.msra.mxu0 %v1980_v6  ;;  %1780 = vmatpush3.bf16.msra.mxu1 %v1981_v7  ;;  %v1990_v16 = vld [vmem:[%s2361_s2 + $0x58] sm:$0xff]   ;;  %v1993_v19 = vld [vmem:[#allocation3 + $0x18] sm:$0xff]   ;;  %v1995_v21 = vld [vmem:[#allocation3 + $0x50] sm:$0xff]  }
  0x2b   :  { %1759 = vmatprep.subr.bf16.mxu0 %v1982_v8  ;;  %1781 = vmatprep.subr.bf16.mxu1 %v1983_v9  ;;  %v1992_v18 = vld [vmem:[%s2361_s2 + $0x18] sm:$0xff]   ;;  %v1994_v20 = vld [vmem:[%s2361_s2 + $0x50] sm:$0xff]   ;;  %v1997_v23 = vld [vmem:[#allocation3 + $0x10] sm:$0xff]  }
  0x2c   :  { %v1996_v22 = vld [vmem:[%s2361_s2 + $0x10] sm:$0xff]   ;;  %v1998_v24 = vld [vmem:[%s2361_s2 + $0x48] sm:$0xff]   ;;  %v1999_v25 = vld [vmem:[#allocation3 + $0x48] sm:$0xff]  }
  0x2d   :  { %v2000_v26 = vld [vmem:[%s2361_s2 + $0x8] sm:$0xff]   ;;  %v2001_v27 = vld [vmem:[#allocation3 + $0x8] sm:$0xff]   ;;  %v2003_v29 = vld [vmem:[#allocation3 + $0x40] sm:$0xff]  }
  0x2e   :  { %1760 = vmatpush3.bf16.msra.mxu0 %v1984_v10  ;;  %1782 = vmatpush3.bf16.msra.mxu1 %v1985_v11  ;;  %v2002_v28 = vld [vmem:[%s2361_s2 + $0x40] sm:$0xff]   ;;  %v2005_v31 = vld [vmem:[#allocation3] sm:$0xff]   ;;  %v2010_v38 = vld [vmem:[#allocation3 + $0xf8] sm:$0xff]  }
  0x2f   :  { %1761 = vmatprep.subr.bf16.mxu0 %v1986_v12  ;;  %1783 = vmatprep.subr.bf16.mxu1 %v1987_v13  ;;  %v2004_v30 = vld [vmem:[%s2361_s2] sm:$0xff]   ;;  %v2011_v39 = vld [vmem:[#allocation3 + $0x178] sm:$0xff]   ;;  %v2022_v50 = vld [vmem:[#allocation3 + $0xe0] sm:$0xff]  }
  0x30   :  { %v77_v32 = vld [vmem:[%s2359_s0] sm:$0xff]  ;;  %v2012_v40 = vld [vmem:[#allocation3 + $0xb8] sm:$0xff]   ;;  %v2023_v51 = vld [vmem:[#allocation3 + $0x160] sm:$0xff]  }
  0x31   :  { %v263_v33 = vld [vmem:[%s2360_s1] sm:$0xff]  ;;  %v1603_v34 = vcombine.low %v77_v32, %v77_v32  ;;  %v1604_v35 = vcombine.high %v77_v32, %v77_v32  ;;  %v2013_v41 = vld [vmem:[#allocation3 + $0x138] sm:$0xff]   ;;  %v2024_v52 = vld [vmem:[#allocation3 + $0xa0] sm:$0xff]  }
  0x32   :  { %1762 = vmatpush3.bf16.msra.mxu0 %v1988_v14  ;;  %1784 = vmatpush3.bf16.msra.mxu1 %v1989_v15  ;;  %v1622_v36 = vcombine.low %v263_v33, %v263_v33  ;;  %v1623_v37 = vcombine.high %v263_v33, %v263_v33  ;;  %v2014_v42 = vld [vmem:[#allocation3 + $0xf0] sm:$0xff]   ;;  %v2018_v46 = vld [vmem:[#allocation3 + $0xe8] sm:$0xff]   ;;  %v2025_v53 = vld [vmem:[#allocation3 + $0x120] sm:$0xff]  }
  0x33   :  { %1763 = vmatprep.subr.bf16.mxu0 %v1990_v16  ;;  %1785 = vmatprep.subr.bf16.mxu1 %v1991_v17  ;;  %v2015_v43 = vld [vmem:[#allocation3 + $0x170] sm:$0xff]   ;;  %v2019_v47 = vld [vmem:[#allocation3 + $0x168] sm:$0xff]   ;;  %v2026_v54 = vld [vmem:[#allocation3 + $0xd8] sm:$0xff]  }
  0x34   :  { %252 = vmatprep.mubr.bf16.mxu0 %v1604_v35  ;;  %438 = vmatprep.mubr.bf16.mxu1 %v1623_v37  ;;  %v2016_v44 = vld [vmem:[#allocation3 + $0xb0] sm:$0xff]   ;;  %v2020_v48 = vld [vmem:[#allocation3 + $0xa8] sm:$0xff]   ;;  %v2027_v55 = vld [vmem:[#allocation3 + $0x158] sm:$0xff]  }
  0x35   :  { %v2017_v45 = vld [vmem:[#allocation3 + $0x130] sm:$0xff]   ;;  %v2021_v49 = vld [vmem:[#allocation3 + $0x128] sm:$0xff]   ;;  %v2028_v56 = vld [vmem:[#allocation3 + $0x98] sm:$0xff]  }
  0x36   :  { %1764 = vmatpush3.bf16.msra.mxu0 %v1992_v18  ;;  %1786 = vmatpush3.bf16.msra.mxu1 %v1993_v19  ;;  %v2029_v57 = vld [vmem:[#allocation3 + $0x118] sm:$0xff]   ;;  %v2030_v58 = vld [vmem:[#allocation3 + $0xd0] sm:$0xff]   ;;  %v2034_v62 = vld [vmem:[#allocation3 + $0xc8] sm:$0xff]  }
  0x37   :  { %1765 = vmatprep.subr.bf16.mxu0 %v1994_v20  ;;  %1787 = vmatprep.subr.bf16.mxu1 %v1995_v21  ;;  %v2031_v59 = vld [vmem:[#allocation3 + $0x150] sm:$0xff]   ;;  %v2035_v63 = vld [vmem:[#allocation3 + $0x148] sm:$0xff]   ;;  %v2038_v2 = vld [vmem:[#allocation3 + $0xc0] sm:$0xff]  }
  0x38   :  { %v2032_v60 = vld [vmem:[#allocation3 + $0x90] sm:$0xff]   ;;  %v2036_v0 = vld [vmem:[#allocation3 + $0x88] sm:$0xff]   ;;  %v2039_v3 = vld [vmem:[#allocation3 + $0x140] sm:$0xff]  }
  0x39   :  { %v2033_v61 = vld [vmem:[#allocation3 + $0x110] sm:$0xff]   ;;  %v2037_v1 = vld [vmem:[#allocation3 + $0x108] sm:$0xff]   ;;  %v2040_v4 = vld [vmem:[#allocation3 + $0x80] sm:$0xff]  }
  0x3a   :  { %1766 = vmatpush3.bf16.msra.mxu0 %v1996_v22  ;;  %1788 = vmatpush3.bf16.msra.mxu1 %v1997_v23  ;;  %v2041_v5 = vld [vmem:[#allocation3 + $0x100] sm:$0xff]   ;;  %v449_v6 = vld [vmem:[%s2360_s1 + $0x8] sm:$0xff]  ;;  %v2050_v16 = vld [vmem:[#allocation3 + $0x1e8] sm:$0xff]  }
  0x3b   :  { %1767 = vmatprep.subr.bf16.mxu0 %v1998_v24  ;;  %1789 = vmatprep.subr.bf16.mxu1 %v1999_v25  ;;  %v1642_v7 = vcombine.low %v449_v6, %v449_v6  ;;  %v1643_v8 = vcombine.high %v449_v6, %v449_v6  ;;  %v637_v9 = vld [vmem:[%s2360_s1 + $0x10] sm:$0xff]  ;;  %v2048_v14 = vld [vmem:[#allocation3 + $0x1f0] sm:$0xff]   ;;  %v2051_v17 = vld [vmem:[#allocation3 + $0x1a8] sm:$0xff]  }
  0x3c   :  { %v1662_v10 = vcombine.low %v637_v9, %v637_v9  ;;  %v1663_v11 = vcombine.high %v637_v9, %v637_v9  ;;  %v2046_v12 = vld [vmem:[#allocation3 + $0x1f8] sm:$0xff]   ;;  %v2049_v15 = vld [vmem:[#allocation3 + $0x1b0] sm:$0xff]   ;;  %v2052_v18 = vld [vmem:[#allocation3 + $0x1e0] sm:$0xff]  }
  0x3d   :  { %v2047_v13 = vld [vmem:[#allocation3 + $0x1b8] sm:$0xff]   ;;  %v2053_v19 = vld [vmem:[#allocation3 + $0x1a0] sm:$0xff]   ;;  %v2056_v22 = vld [vmem:[#allocation3 + $0x1d0] sm:$0xff]  }
  0x3e   :  { %1768 = vmatpush3.bf16.msra.mxu0 %v2000_v26  ;;  %1790 = vmatpush3.bf16.msra.mxu1 %v2001_v27  ;;  %v2054_v20 = vld [vmem:[#allocation3 + $0x1d8] sm:$0xff]   ;;  %v825_v23 = vld [vmem:[%s2360_s1 + $0x18] sm:$0xff]  ;;  %v2057_v27 = vld [vmem:[#allocation3 + $0x190] sm:$0xff]  }
  0x3f   :  { %1769 = vmatprep.subr.bf16.mxu0 %v2002_v28  ;;  %1791 = vmatprep.subr.bf16.mxu1 %v2003_v29  ;;  %v2055_v21 = vld [vmem:[#allocation3 + $0x198] sm:$0xff]   ;;  %v1683_v24 = vcombine.high %v825_v23, %v825_v23  ;;  %v2066_v28 = vld [vmem:[#allocation5 + $0x70] sm:$0xff]   ;;  %v2058_v29 = vld [vmem:[#allocation3 + $0x1c8] sm:$0xff]  }
  0x40   :  { %v2064_v25 = vld [vmem:[#allocation5 + $0x78] sm:$0xff]   ;;  %v2069_v32 = vld [vmem:[#allocation5 + $0x28] sm:$0xff]   ;;  %v2061_v35 = vld [vmem:[#allocation3 + $0x180] sm:$0xff]  }
  0x41   :  { %v2065_v26 = vld [vmem:[#allocation5 + $0x38] sm:$0xff]   ;;  %v2059_v33 = vld [vmem:[#allocation3 + $0x188] sm:$0xff]   ;;  %v2070_v37 = vld [vmem:[#allocation5 + $0x60] sm:$0xff]  }
  0x42   :  { %1770 = vmatpush3.bf16.msra.mxu0 %v2004_v30  ;;  %1792 = vmatpush3.bf16.msra.mxu1 %v2005_v31  ;;  %v2067_v30 = vld [vmem:[#allocation5 + $0x30] sm:$0xff]   ;;  %v2068_v31 = vld [vmem:[#allocation5 + $0x68] sm:$0xff]  }
  0x43   :  { %1799 = vmatprep.subr.bf16.mxu0 %v2010_v38  ;;  %1821 = vmatprep.subr.bf16.mxu1 %v2011_v39  ;;  %v2071_v38 = vld [vmem:[#allocation5 + $0x20] sm:$0xff]   ;;  %v2072_v39 = vld [vmem:[#allocation5 + $0x58] sm:$0xff]  }
  0x45   :  { %253 = vmatmul.mubr.bf16.vlgmr.msra.gmra.mxu0 %v1603_v34  ;;  %439 = vmatmul.mubr.bf16.vlgmr.msra.gmra.mxu1 %v1622_v36  ;;  %v2060_v34 = vld [vmem:[#allocation3 + $0x1c0] sm:$0xff]   ;;  %v1682_v36 = vcombine.low %v825_v23, %v825_v23  ;;  %v2102_v23 = vld [vmem:[#allocation5 + $0x128] sm:$0xff]  }
  0x46   :  { %1800 = vmatpush3.bf16.msra.mxu0 %v2012_v40  ;;  %1822 = vmatpush3.bf16.msra.mxu1 %v2013_v41  ;;  %v2073_v40 = vld [vmem:[#allocation5 + $0x18] sm:$0xff]   ;;  %v2074_v41 = vld [vmem:[#allocation5 + $0x50] sm:$0xff]  }
  0x47   :  { %1801 = vmatprep.subr.bf16.mxu0 %v2014_v42  ;;  %1823 = vmatprep.subr.bf16.mxu1 %v2015_v43  ;;  %v2075_v42 = vld [vmem:[#allocation5 + $0x10] sm:$0xff]   ;;  %v2076_v43 = vld [vmem:[#allocation5 + $0x48] sm:$0xff]  }
  0x48   :  { %626 = vmatprep.mubr.bf16.mxu0 %v1643_v8  ;;  %814 = vmatprep.mubr.bf16.mxu1 %v1663_v11 }
  0x4a   :  { %1802 = vmatpush3.bf16.msra.mxu0 %v2016_v44  ;;  %1824 = vmatpush3.bf16.msra.mxu1 %v2017_v45  ;;  %v2077_v44 = vld [vmem:[#allocation5 + $0x8] sm:$0xff]   ;;  %v2078_v45 = vld [vmem:[#allocation5 + $0x40] sm:$0xff]  }
  0x4b   :  { %1803 = vmatprep.subr.bf16.mxu0 %v2018_v46  ;;  %1825 = vmatprep.subr.bf16.mxu1 %v2019_v47  ;;  %v2079_v46 = vld [vmem:[#allocation5] sm:$0xff]   ;;  %v2082_v47 = vld [vmem:[#allocation5 + $0xf8] sm:$0xff]  }
  0x4e   :  { %1804 = vmatpush3.bf16.msra.mxu0 %v2020_v48  ;;  %1826 = vmatpush3.bf16.msra.mxu1 %v2021_v49  ;;  %v2083_v48 = vld [vmem:[#allocation5 + $0xb8] sm:$0xff]   ;;  %v2084_v49 = vld [vmem:[#allocation5 + $0xf0] sm:$0xff]  }
  0x4f   :  { %1805 = vmatprep.subr.bf16.mxu0 %v2022_v50  ;;  %1827 = vmatprep.subr.bf16.mxu1 %v2023_v51  ;;  %v2085_v50 = vld [vmem:[#allocation5 + $0xb0] sm:$0xff]   ;;  %v2086_v51 = vld [vmem:[#allocation5 + $0xe8] sm:$0xff]  }
  0x52   :  { %1806 = vmatpush3.bf16.msra.mxu0 %v2024_v52  ;;  %1828 = vmatpush3.bf16.msra.mxu1 %v2025_v53  ;;  %v2087_v52 = vld [vmem:[#allocation5 + $0xa8] sm:$0xff]   ;;  %v2088_v53 = vld [vmem:[#allocation5 + $0xe0] sm:$0xff]  }
  0x53   :  { %1807 = vmatprep.subr.bf16.mxu0 %v2026_v54  ;;  %1829 = vmatprep.subr.bf16.mxu1 %v2027_v55  ;;  %v2089_v54 = vld [vmem:[#allocation5 + $0xa0] sm:$0xff]   ;;  %v2090_v55 = vld [vmem:[#allocation5 + $0xd8] sm:$0xff]  }
  0x56   :  { %1808 = vmatpush3.bf16.msra.mxu0 %v2028_v56  ;;  %1830 = vmatpush3.bf16.msra.mxu1 %v2029_v57  ;;  %v2091_v56 = vld [vmem:[#allocation5 + $0x98] sm:$0xff]   ;;  %v2092_v57 = vld [vmem:[#allocation5 + $0xd0] sm:$0xff]  }
  0x57   :  { %1809 = vmatprep.subr.bf16.mxu0 %v2030_v58  ;;  %1831 = vmatprep.subr.bf16.mxu1 %v2031_v59  ;;  %v2093_v58 = vld [vmem:[#allocation5 + $0x90] sm:$0xff]   ;;  %v2094_v59 = vld [vmem:[#allocation5 + $0xc8] sm:$0xff]  }
  0x5a   :  { %1810 = vmatpush3.bf16.msra.mxu0 %v2032_v60  ;;  %1832 = vmatpush3.bf16.msra.mxu1 %v2033_v61  ;;  %v2095_v60 = vld [vmem:[#allocation5 + $0x88] sm:$0xff]   ;;  %v2096_v61 = vld [vmem:[#allocation5 + $0xc0] sm:$0xff]  }
  0x5b   :  { %1811 = vmatprep.subr.bf16.mxu0 %v2034_v62  ;;  %1833 = vmatprep.subr.bf16.mxu1 %v2035_v63  ;;  %v2097_v62 = vld [vmem:[#allocation5 + $0x80] sm:$0xff]   ;;  %v2186_v63 = vmov 0.0  }
  0x5e   :  { %1812 = vmatpush3.bf16.msra.mxu0 %v2036_v0  ;;  %1834 = vmatpush3.bf16.msra.mxu1 %v2037_v1 }
  0x5f   :  { %1813 = vmatprep.subr.bf16.mxu0 %v2038_v2  ;;  %1835 = vmatprep.subr.bf16.mxu1 %v2039_v3  ;;  %v1602_v2 = vld [vmem:[%s2362_s3] ss:$0 sm:$0xff] }
  0x62   :  { %1814 = vmatpush3.bf16.msra.mxu0 %v2040_v4  ;;  %1836 = vmatpush3.bf16.msra.mxu1 %v2041_v5  ;;  %v1621_v4 = vld [vmem:[%s2364_s5] ss:$0 sm:$0xff] }
  0x63   :  { %1843 = vmatprep.subr.bf16.mxu0 %v2046_v12  ;;  %1865 = vmatprep.subr.bf16.mxu1 %v2064_v25 }
  0x65   :  { %627 = vmatmul.mubr.bf16.vlgmr.msra.gmra.mxu0 %v1642_v7  ;;  %815 = vmatmul.mubr.bf16.vlgmr.msra.gmra.mxu1 %v1662_v10 }
  0x66   :  { %1844 = vmatpush3.bf16.msra.mxu0 %v2047_v13  ;;  %1002 = vmatprep.mubr.bf16.mxu0 %v1683_v24  ;;  %v2103_v24 = vld [vmem:[#allocation5 + $0x120] sm:$0xff]  }
  0x67   :  { %1845 = vmatprep.subr.bf16.mxu0 %v2048_v14  ;;  %1866 = vmatpush3.bf16.msra.mxu1 %v2065_v26 }
  0x68   :  { %1867 = vmatprep.subr.bf16.mxu1 %v2066_v28 }
  0x6a   :  { %1846 = vmatpush3.bf16.msra.mxu0 %v2049_v15 }
  0x6b   :  { %1847 = vmatprep.subr.bf16.mxu0 %v2050_v16  ;;  %1868 = vmatpush3.bf16.msra.mxu1 %v2067_v30 }
  0x6c   :  { %1869 = vmatprep.subr.bf16.mxu1 %v2068_v31  ;;  %v2104_v31 = vld [vmem:[#allocation5 + $0x118] sm:$0xff]  }
  0x6e   :  { %1848 = vmatpush3.bf16.msra.mxu0 %v2051_v17 }
  0x6f   :  { %1849 = vmatprep.subr.bf16.mxu0 %v2052_v18  ;;  %1870 = vmatpush3.bf16.msra.mxu1 %v2069_v32 }
  0x70   :  { %1871 = vmatprep.subr.bf16.mxu1 %v2070_v37 }
  0x72   :  { %1850 = vmatpush3.bf16.msra.mxu0 %v2053_v19 }
  0x73   :  { %1851 = vmatprep.subr.bf16.mxu0 %v2054_v20  ;;  %1872 = vmatpush3.bf16.msra.mxu1 %v2071_v38 }
  0x74   :  { %1873 = vmatprep.subr.bf16.mxu1 %v2072_v39 }
  0x76   :  { %1852 = vmatpush3.bf16.msra.mxu0 %v2055_v21  ;;  %v2100_v21 = vld [vmem:[#allocation5 + $0x138] sm:$0xff]  }
  0x77   :  { %1853 = vmatprep.subr.bf16.mxu0 %v2056_v22  ;;  %1874 = vmatpush3.bf16.msra.mxu1 %v2073_v40  ;;  %v2101_v22 = vld [vmem:[#allocation5 + $0x130] sm:$0xff]  }
  0x78   :  { %1875 = vmatprep.subr.bf16.mxu1 %v2074_v41  ;;  %v2105_v40 = vld [vmem:[#allocation5 + $0x110] sm:$0xff]  }
  0x7a   :  { %1854 = vmatpush3.bf16.msra.mxu0 %v2057_v27  ;;  %v1641_v27 = vld [vmem:[%s2364_s5 + $0x1] ss:$0 sm:$0xff] }
  0x7b   :  { %1855 = vmatprep.subr.bf16.mxu0 %v2058_v29  ;;  %1876 = vmatpush3.bf16.msra.mxu1 %v2075_v42  ;;  %v1661_v29 = vld [vmem:[%s2364_s5 + $0x2] ss:$0 sm:$0xff] }
  0x7c   :  { %1877 = vmatprep.subr.bf16.mxu1 %v2076_v43 }
  0x7e   :  { %1856 = vmatpush3.bf16.msra.mxu0 %v2059_v33 }
  0x7f   :  { %1857 = vmatprep.subr.bf16.mxu0 %v2060_v34  ;;  %1878 = vmatpush3.bf16.msra.mxu1 %v2077_v44 }
  0x80   :  { %1879 = vmatprep.subr.bf16.mxu1 %v2078_v45  ;;  %v2106_v45 = vld [vmem:[#allocation5 + $0x108] sm:$0xff]  }
  0x82   :  { %1858 = vmatpush3.bf16.msra.mxu0 %v2061_v35 }
  0x83   :  { %1880 = vmatpush3.bf16.msra.mxu1 %v2079_v46  ;;  %1887 = vmatprep.subr.bf16.mxu0 %v2082_v47  ;;  %v2107_v46 = vld [vmem:[#allocation5 + $0x100] sm:$0xff]  }
  0x84   :  { %1927 = vmatprep.subr.bf16.mxu1 %v2186_v63 }
  0x85   :  { %1003 = vmatmul.mubr.bf16.vlgmr.msra.gmra.mxu0 %v1682_v36 }
  0x86   :  { %1888 = vmatpush3.bf16.msra.mxu0 %v2083_v48 }
  0x87   :  { %1889 = vmatprep.subr.bf16.mxu0 %v2084_v49 }
  0x8a   :  { %1890 = vmatpush3.bf16.msra.mxu0 %v2085_v50 }
  0x8b   :  { %1891 = vmatprep.subr.bf16.mxu0 %v2086_v51  ;;  %v1681_v51 = vld [vmem:[%s2364_s5 + $0x3] ss:$0 sm:$0xff] }
  0x8e   :  { %1892 = vmatpush3.bf16.msra.mxu0 %v2087_v52 }
  0x8f   :  { %1893 = vmatprep.subr.bf16.mxu0 %v2088_v53 }
  0x92   :  { %1894 = vmatpush3.bf16.msra.mxu0 %v2089_v54 }
  0x93   :  { %1895 = vmatprep.subr.bf16.mxu0 %v2090_v55 }
  0x96   :  { %1896 = vmatpush3.bf16.msra.mxu0 %v2091_v56 }
  0x97   :  { %1897 = vmatprep.subr.bf16.mxu0 %v2092_v57 }
  0x9a   :  { %1898 = vmatpush3.bf16.msra.mxu0 %v2093_v58 }
  0x9b   :  { %1899 = vmatprep.subr.bf16.mxu0 %v2094_v59 }
  0x9e   :  { %1900 = vmatpush3.bf16.msra.mxu0 %v2095_v60  ;;  %v2109_v60 = vld [vmem:[#allocation7 + $0x38] sm:$0xff]  }
  0x9f   :  { %1901 = vmatprep.subr.bf16.mxu0 %v2096_v61  ;;  %v2110_v61 = vld [vmem:[#allocation7 + $0x30] sm:$0xff]  }
  0xa2   :  { %1902 = vmatpush3.bf16.msra.mxu0 %v2097_v62  ;;  %v2111_v62 = vld [vmem:[#allocation7 + $0x28] sm:$0xff]  }
  0xa3   :  { %1947 = vmatprep.subr.bf16.mxu0 %v2186_v63 }
 0x105   :  { %v1771_v0 = vpop.f32.mrf.mxu0  ;;  %v1793_v1 = vpop.f32.mrf.mxu1 }
 0x107   :  { %v1772_v3 = vpop.f32.mrf.mxu0  ;;  %v1794_v5 = vpop.f32.mrf.mxu1 }
 0x108   :  { %v1773_v6 = vadd.f32 %v1772_v3, %v1771_v0  ;;  %v1795_v7 = vadd.f32 %v1794_v5, %v1793_v1  ;;  %v2112_v0 = vld [vmem:[#allocation7 + $0x20] sm:$0xff]   ;;  %v2113_v1 = vld [vmem:[#allocation7 + $0x18] sm:$0xff]   ;;  %v2115_v3 = vld [vmem:[#allocation7 + $0x8] sm:$0xff]  }
 0x109   :  { %v1774_v8 = vpop.f32.mrf.mxu0  ;;  %v1796_v9 = vpop.f32.mrf.mxu1 }
 0x10a   :  { %v255_v10 = vadd.f32 %v1773_v6, %v1602_v2  ;;  %v441_v11 = vadd.f32 %v1795_v7, %v1621_v4  ;;  %v2114_v2 = vld [vmem:[#allocation7 + $0x10] sm:$0xff]   ;;  %v2116_v4 = vld [vmem:[#allocation7] sm:$0xff]  }
 0x10b   :  { %v1775_v12 = vpop.f32.mrf.mxu0  ;;  %v1797_v13 = vpop.f32.mrf.mxu1 }
 0x10c   :  { %v260_v14 = vmax.f32 %v255_v10, 0.0  ;;  %v446_v15 = vmax.f32 %v441_v11, 0.0 }
 0x10e   :  { %v261_v16 = vpack.c.bf16 %v260_v14, %v260_v14  ;;  %v447_v17 = vpack.c.bf16 %v446_v15, %v446_v15  ;;  %v1700_v14 = vld [vmem:[%s2366_s7] ss:$0 sm:$0xff] }
 0x110   :  { %262 = vst [vmem:[#allocation2] sm:$0xf] %v261_v16  ;;  %448 = vst [vmem:[#allocation2 + $0x4] sm:$0xf] %v447_v17 }
 0x117   :  { %v1013_v18 = vld [vmem:[#allocation2] sm:$0xff] }
 0x118   :  { %v1701_v19 = vcombine.low %v1013_v18, %v1013_v18  ;;  %v1702_v20 = vcombine.high %v1013_v18, %v1013_v18 }
 0x11a   :  { %1393 = vmatprep.mubr.bf16.mxu1 %v1702_v20 }
 0x11b   :  { %1394 = vmatmul.mubr.bf16.vlgmr.msra.gmra.mxu1 %v1701_v19 }
 0x11c   :  { %1928 = vmatpush3.bf16.msra.mxu1 %v2100_v21  ;;  %1943 = vmatprep.mubr.msk.bf16.mxu1 %vm2187_vm0, %v2186_v63 }
 0x11d   :  { %1929 = vmatprep.subr.bf16.mxu1 %v2186_v63 }
 0x120   :  { %1930 = vmatpush3.bf16.msra.mxu1 %v2101_v22 }
 0x121   :  { %1931 = vmatprep.subr.bf16.mxu1 %v2186_v63 }
 0x124   :  { %1932 = vmatpush3.bf16.msra.mxu1 %v2102_v23 }
 0x125   :  { %1933 = vmatprep.subr.bf16.mxu1 %v2186_v63  ;;  %v1815_v25 = vpop.f32.mrf.mxu0  ;;  %v1837_v26 = vpop.f32.mrf.mxu1 }
 0x127   :  { %v1816_v28 = vpop.f32.mrf.mxu0  ;;  %v1838_v30 = vpop.f32.mrf.mxu1 }
 0x128   :  { %1934 = vmatpush3.bf16.msra.mxu1 %v2103_v24  ;;  %v1817_v32 = vadd.f32 %v1816_v28, %v1815_v25  ;;  %v1839_v33 = vadd.f32 %v1838_v30, %v1837_v26  ;;  %v1746_v24 = vld [vmem:[%s2368_s9] ss:$0 sm:$0xff] }
 0x129   :  { %1935 = vmatprep.subr.bf16.mxu1 %v2186_v63  ;;  %v1818_v34 = vpop.f32.mrf.mxu0  ;;  %v1840_v35 = vpop.f32.mrf.mxu1 }
 0x12a   :  { %v629_v36 = vadd.f32 %v1817_v32, %v1641_v27  ;;  %v817_v37 = vadd.f32 %v1839_v33, %v1661_v29 }
 0x12b   :  { %v1819_v38 = vpop.f32.mrf.mxu0  ;;  %v1841_v39 = vpop.f32.mrf.mxu1 }
 0x12c   :  { %1936 = vmatpush3.bf16.msra.mxu1 %v2104_v31  ;;  %v634_v41 = vmax.f32 %v629_v36, 0.0  ;;  %v822_v42 = vmax.f32 %v817_v37, 0.0 }
 0x12d   :  { %1937 = vmatprep.subr.bf16.mxu1 %v2186_v63 }
 0x12e   :  { %v635_v43 = vpack.c.bf16 %v634_v41, %v634_v41  ;;  %v823_v44 = vpack.c.bf16 %v822_v42, %v822_v42 }
 0x130   :  { %1938 = vmatpush3.bf16.msra.mxu1 %v2105_v40  ;;  %636 = vst [vmem:[#allocation2 + $0x8] sm:$0xf] %v635_v43  ;;  %824 = vst [vmem:[#allocation2 + $0xc] sm:$0xf] %v823_v44 }
 0x131   :  { %1939 = vmatprep.subr.bf16.mxu1 %v2186_v63 }
 0x134   :  { %1940 = vmatpush3.bf16.msra.mxu1 %v2106_v45 }
 0x135   :  { %1941 = vmatprep.subr.bf16.mxu1 %v2186_v63 }
 0x137   :  { %v1014_v47 = vld [vmem:[#allocation2 + $0x8] sm:$0xff] }
 0x138   :  { %1942 = vmatpush3.bf16.msra.mxu1 %v2107_v46  ;;  %v1703_v48 = vcombine.low %v1014_v47, %v1014_v47  ;;  %v1704_v49 = vcombine.high %v1014_v47, %v1014_v47 }
 0x13a   :  { %1433 = vmatprep.mubr.bf16.mxu0 %v1704_v49 }
 0x13b   :  { %1434 = vmatmul.mubr.bf16.vlgmr.msra.gmra.mxu0 %v1703_v48 }
 0x13c   :  { %1963 = vmatprep.mubr.msk.bf16.mxu0 %vm2187_vm0, %v2186_v63  ;;  %1948 = vmatpush3.bf16.msra.mxu0 %v2109_v60 }
 0x13d   :  { %1949 = vmatprep.subr.bf16.mxu0 %v2186_v63 }
 0x140   :  { %1950 = vmatpush3.bf16.msra.mxu0 %v2110_v61 }
 0x141   :  { %1951 = vmatprep.subr.bf16.mxu0 %v2186_v63 }
 0x144   :  { %1952 = vmatpush3.bf16.msra.mxu0 %v2111_v62 }
 0x145   :  { %v1859_v50 = vpop.f32.mrf.mxu0  ;;  %1953 = vmatprep.subr.bf16.mxu0 %v2186_v63 }
 0x147   :  { %v1860_v52 = vpop.f32.mrf.mxu0 }
 0x148   :  { %v1861_v53 = vadd.f32 %v1860_v52, %v1859_v50  ;;  %1954 = vmatpush3.bf16.msra.mxu0 %v2112_v0 }
 0x149   :  { %v1862_v54 = vpop.f32.mrf.mxu0  ;;  %1955 = vmatprep.subr.bf16.mxu0 %v2186_v63 }
 0x14a   :  { %v1005_v55 = vadd.f32 %v1861_v53, %v1681_v51 }
 0x14b   :  { %v1863_v56 = vpop.f32.mrf.mxu0 }
 0x14c   :  { %v1010_v57 = vmax.f32 %v1005_v55, 0.0  ;;  %1956 = vmatpush3.bf16.msra.mxu0 %v2113_v1 }
 0x14d   :  { %1957 = vmatprep.subr.bf16.mxu0 %v2186_v63 }
 0x14e   :  { %v1011_v58 = vpack.c.bf16 %v1010_v57, %v1010_v57 }
 0x150   :  { %1012 = vst [vmem:[#allocation2 + $0x10] sm:$0xf] %v1011_v58  ;;  %1958 = vmatpush3.bf16.msra.mxu0 %v2114_v2 }
 0x151   :  { %1959 = vmatprep.subr.bf16.mxu0 %v2186_v63 }
 0x154   :  { %1960 = vmatpush3.bf16.msra.mxu0 %v2115_v3 }
 0x155   :  { %1961 = vmatprep.subr.bf16.mxu0 %v2186_v63 }
 0x157   :  { %v2108_v59 = vld [vmem:[#allocation2 + $0x10] ss:$0 sps:$4 sm:$0xff]  }
 0x158   :  { %1944 = vmatmul.mubr.bf16.vlgmr.msra.gmra.mxu1 %v2108_v59  ;;  %1962 = vmatpush3.bf16.msra.mxu0 %v2116_v4 }
 0x1db   :  { %v1881_v5 = vpop.f32.mrf.mxu1 }
 0x1dd   :  { %v1882_v6 = vpop.f32.mrf.mxu1 }
 0x1de   :  { %v1883_v13 = vadd.f32 %v1882_v6, %v1881_v5 }
 0x1df   :  { %v1884_v7 = vpop.f32.mrf.mxu1 }
 0x1e0   :  { %v1396_v16 = vadd.f32 %v1883_v13, %v1700_v14 }
 0x1e1   :  { %v1885_v8 = vpop.f32.mrf.mxu1 }
 0x1fb   :  { %v1903_v9 = vpop.f32.mrf.mxu0 }
 0x1fd   :  { %v1904_v10 = vpop.f32.mrf.mxu0 }
 0x1fe   :  { %v1905_v15 = vadd.f32 %v1904_v10, %v1903_v9 }
 0x1ff   :  { %v1906_v11 = vpop.f32.mrf.mxu0 }
 0x200   :  { %v1436_v17 = vadd.f32 %v1905_v15, %v1396_v16 }
 0x201   :  { %v1907_v12 = vpop.f32.mrf.mxu0 }
 0x218   :  { %v1475_v18 = vpop.f32.mrf.mxu1 }
 0x219   :  { %v1476_v63 = vadd.f32 %v1475_v18, %v1436_v17 }
 0x21a   :  { %v1945_v19 = vpop.f32.mrf.mxu1 }
 0x21b   :  { %v1481_v20 = vmax.f32 %v1476_v63, 0.0 }
 0x21c   :  { %v1478_v21 = vpop.f32.mrf.mxu1 }
 0x21d   :  { %v1482_v22 = vpack.c.bf16 %v1481_v20, %v1481_v20 }
 0x21e   :  { %v1946_v23 = vpop.f32.mrf.mxu1 }
 0x21f   :  { %1964 = vmatmul.mubr.bf16.vlgmr.msra.gmra.mxu0 %v1482_v22 }
 0x2df   :  { %v1588_v25 = vpop.f32.mrf.mxu0 }
 0x2e0   :  { %v1589_v26 = vadd.f32 %v1746_v24, %v1588_v25 }
 0x2e1   :  { %v1965_v27 = vpop.f32.mrf.mxu0 }
 0x2e2   :  { %v1594_v28 = vpack.c.bf16 %v1589_v26, %v1589_v26 }
 0x2e3   :  { %v1591_v29 = vpop.f32.mrf.mxu0 }
 0x2e4   :  { %1595 = vst [vmem:[%s2369_s10] sm:$0xf] %v1594_v28 }
 0x2e5   :  { %v1966_v30 = vpop.f32.mrf.mxu0 }
 0x2e6   :  { %1600 = vsyncpa [#allocation4], 1 }
 0x2e7   :  { %1601 = vsyncpa [#allocation6], 1 }

</bundles_post_ra>
